<compile_context>
chip_gen: v7x
topology: tpu7x:2x2x1
jax: 0.10.0
libtpu: 0.0.40
codegen_flags: <defaults>
</compile_context>

<pallas_src>
import jax
import jax.numpy as jnp
from jax.experimental import pallas as pl
from jax.experimental.pallas import tpu as pltpu

OUT_PAD = 128       # lane-dense padded width for the 2-channel offset output
TILE_R_MIN = 128    # minimum row-tile height (sublane friendly, keeps many equal tiles)


def _round_up(x, m):
    return ((x + m - 1) // m) * m


def _masked_conv(h, w_ref, b_ref, m):
    """k=3 / stride=1 / zero-pad=1 conv over the row axis + bias + output mask.

    h: (TILE_R, C) f32 activations.  w_ref: (3*C, Cout) bf16, tap order [t-1, t, t+1].
    b_ref: (1, Cout) f32.  m: (TILE_R, 1) f32.  Relies on the packing invariant that every
    segment is followed by >=1 zero row and every tile ends in a zero row, so the roll
    wrap-around only ever reads zeros (identical to the conv's own zero padding).
    """
    rows, c = h.shape
    prev = pltpu.roll(h, shift=1, axis=0)          # row t-1 (XLU, non-negative shift)
    nxt = pltpu.roll(h, shift=rows - 1, axis=0)    # row t+1
    if c < 128:
        # Small C: one K=3*C matmul fills the MXU contraction dim better than 3 thin dots.
        hcat = jnp.concatenate([prev, h, nxt], axis=-1).astype(jnp.bfloat16)
        y = jnp.dot(hcat, w_ref[...], preferred_element_type=jnp.float32)
    else:
        # Large C (e.g. 512): three accumulating dots, no 3x-wide concat copy in VMEM.
        y = jnp.dot(prev.astype(jnp.bfloat16), w_ref[:c, :],
                    preferred_element_type=jnp.float32)
        y += jnp.dot(h.astype(jnp.bfloat16), w_ref[c:2 * c, :],
                     preferred_element_type=jnp.float32)
        y += jnp.dot(nxt.astype(jnp.bfloat16), w_ref[2 * c:, :],
                     preferred_element_type=jnp.float32)
    return (y + b_ref[...]) * m


def _reg_head_kernel(x_ref, m_ref, sm_ref,
                     w1_ref, b1_ref, w2_ref, b2_ref, w3_ref, b3_ref, out_ref):
    """One fixed-size row tile per grid step; rows are packed (level, batch) segments."""
    x = x_ref[...].astype(jnp.float32)   # (TILE_R, Cin) raw (un-masked) features
    m = m_ref[...]                       # (TILE_R, 1) validity mask (0/1)
    sm = sm_ref[...]                     # (TILE_R, 1) mask * per-level Scale()

    h = jnp.maximum(_masked_conv(x, w1_ref, b1_ref, m), 0.0)   # head[0] + Identity + ReLU
    h = jnp.maximum(_masked_conv(h, w2_ref, b2_ref, m), 0.0)   # head[1] + Identity + ReLU
    o = _masked_conv(h, w3_ref, b3_ref, sm)                    # offset_head * (mask*scale)
    out_ref[...] = jnp.maximum(o, 0.0)                         # final ReLU


def reg_head_forward(fpn_feats, fpn_masks, params, scales):
    """fpn_feats[l]: (B, T_l, Cin); fpn_masks[l]: (B, T_l, 1) 0/1 float; scales[l]: scalar.
    params = (w1, b1, w2, b2, w3, b3); conv weights stored as (3, Cin, Cout)
    (== torch Conv1d weight (Cout, Cin, 3) permuted to (K, Cin, Cout)), biases as (1, Cout).
    Returns a tuple of (B, T_l, 2) regression offsets."""
    L = len(fpn_feats)
    assert L == len(fpn_masks) == len(scales)
    B, _, Cin = fpn_feats[0].shape
    Ts = [int(f.shape[1]) for f in fpn_feats]

    w1, b1, w2, b2, w3, b3 = params
    F = w1.shape[-1]

    # ---- ragged packing: (level, batch) segments + 1 zero separator row -> TILE_R tiles ----
    TILE_R = max(TILE_R_MIN, _round_up(max(Ts) + 1, 8))
    # TODO(synk): segments longer than TILE_R would need halo-overlapped row tiles; here
    # TILE_R is auto-sized to the longest segment so every segment fits inside one tile.
    offsets = {}
    tile_i, used = 0, 0
    for l in range(L):
        for b in range(B):
            need = Ts[l] + 1                     # segment + trailing zero separator row
            if used + need > TILE_R:
                tile_i, used = tile_i + 1, 0
            offsets[(l, b)] = tile_i * TILE_R + used
            used += need
    n_tiles = tile_i + 1
    R = n_tiles * TILE_R

    feats = jnp.zeros((R, Cin), jnp.bfloat16)    # bf16 in HBM: half the input DMA bytes
    mask = jnp.zeros((R, 1), jnp.float32)
    smask = jnp.zeros((R, 1), jnp.float32)
    for l in range(L):
        s = jnp.asarray(scales[l], jnp.float32)
        for b in range(B):
            off, T = offsets[(l, b)], Ts[l]
            feats = feats.at[off:off + T].set(fpn_feats[l][b].astype(jnp.bfloat16))
            mv = fpn_masks[l][b].astype(jnp.float32)
            mask = mask.at[off:off + T].set(mv)
            smask = smask.at[off:off + T].set(mv * s)   # Scale() folded into the mask

    # Weights: (3, Cin, Cout) -> (3*Cin, Cout) bf16, tap order [t-1, t, t+1]; biases f32.
    W1 = w1.reshape(3 * Cin, F).astype(jnp.bfloat16)
    W2 = w2.reshape(3 * F, F).astype(jnp.bfloat16)
    W3 = jnp.zeros((3 * F, OUT_PAD), jnp.bfloat16).at[:, :2].set(
        w3.reshape(3 * F, 2).astype(jnp.bfloat16))          # lane-dense padded output
    B1 = b1.reshape(1, F).astype(jnp.float32)
    B2 = b2.reshape(1, F).astype(jnp.float32)
    B3 = jnp.zeros((1, OUT_PAD), jnp.float32).at[:, :2].set(
        b3.reshape(1, 2).astype(jnp.float32))

    def const_spec(shape):                       # weights stay resident across all tiles
        zeros = (0,) * len(shape)
        return pl.BlockSpec(shape, lambda i: zeros)

    # VMEM budget: 2x-buffered tile activations + resident weights + in-kernel temporaries,
    # with headroom; capped under v7x's 64 MiB physical VMEM.
    act_bytes = TILE_R * (Cin * 2 + 2 * 128 * 4 + OUT_PAD * 4)
    wgt_bytes = 2 * (W1.size + W2.size + W3.size) + 4 * (B1.size + B2.size + B3.size)
    tmp_bytes = 8 * TILE_R * max(3 * Cin, 3 * F, OUT_PAD) * 4
    vmem_limit = int(min(60 << 20, max(24 << 20, 2 * (2 * act_bytes + wgt_bytes) + tmp_bytes)))

    out = pl.pallas_call(
        _reg_head_kernel,
        out_shape=jax.ShapeDtypeStruct((R, OUT_PAD), jnp.float32),
        grid=(n_tiles,),
        in_specs=[
            pl.BlockSpec((TILE_R, Cin), lambda i: (i, 0)),   # packed raw features (bf16)
            pl.BlockSpec((TILE_R, 1), lambda i: (i, 0)),     # packed mask
            pl.BlockSpec((TILE_R, 1), lambda i: (i, 0)),     # packed mask * Scale()
            const_spec(W1.shape), const_spec(B1.shape),
            const_spec(W2.shape), const_spec(B2.shape),
            const_spec(W3.shape), const_spec(B3.shape),
        ],
        out_specs=pl.BlockSpec((TILE_R, OUT_PAD), lambda i: (i, 0)),
        compiler_params=pltpu.CompilerParams(
            dimension_semantics=("parallel",),               # many equal tiles -> TC balance
            vmem_limit_bytes=vmem_limit),
    )(feats, mask, smask, W1, B1, W2, B2, W3, B3)

    # Gather real rows / the 2 real offset channels back per level (static slices).
    off2 = out[:, :2]
    return tuple(
        jnp.stack([off2[offsets[(l, b)]:offsets[(l, b)] + Ts[l]] for b in range(B)])
        for l in range(L))


# ---------------- pure-JAX reference (for correctness check) ----------------
def _ref_level(x, m, params, scale):
    """Reference of the PyTorch forward, matching the kernel's bf16 MXU feeding
    (bf16 conv operands, f32 accumulation)."""
    w1, b1, w2, b2, w3, b3 = params

    def mconv(h, w, b):
        y = jax.lax.conv_general_dilated(
            h.astype(jnp.bfloat16), w.astype(jnp.bfloat16),
            window_strides=(1,), padding="SAME",
            dimension_numbers=("NWC", "WIO", "NWC"),
            preferred_element_type=jnp.float32,
            precision=jax.lax.Precision.HIGHEST)
        return (y + b[None].astype(jnp.float32)) * m

    h = jax.nn.relu(mconv(x, w1, b1))
    h = jax.nn.relu(mconv(h, w2, b2))
    o = mconv(h, w3, b3)
    return jax.nn.relu(scale * o)


if __name__ == "__main__":
    B = 2
    input_dim = 32
    feat_dim = 32
    fpn_levels = 3
    Ts = [32, 16, 8]

    key = jax.random.PRNGKey(0)
    ks = jax.random.split(key, 16)

    # Deterministic synthetic parameters (conv weights as (K=3, Cin, Cout), biases (1, Cout)).
    w1 = 0.1 * jax.random.normal(ks[0], (3, input_dim, feat_dim), jnp.float32)
    b1 = 0.1 * jax.random.normal(ks[1], (1, feat_dim), jnp.float32)
    w2 = 0.1 * jax.random.normal(ks[2], (3, feat_dim, feat_dim), jnp.float32)
    b2 = 0.1 * jax.random.normal(ks[3], (1, feat_dim), jnp.float32)
    w3 = 0.1 * jax.random.normal(ks[4], (3, feat_dim, 2), jnp.float32)
    b3 = 0.1 * jax.random.normal(ks[5], (1, 2), jnp.float32)
    params = (w1, b1, w2, b2, w3, b3)
    scales = [jnp.float32(1.0 + 0.1 * l) for l in range(fpn_levels)]  # Scale() params

    # FPN features (B, T, C) and 0/1 masks (B, T, 1) with a valid prefix per level.
    fpn_feats, fpn_masks = [], []
    for l, T in enumerate(Ts):
        fpn_feats.append(jax.random.normal(ks[6 + l], (B, T, input_dim), jnp.float32))
        valid = T - 2 - l
        t_pos = jnp.arange(T)[None, :, None]                      # (1, T, 1)
        m = jnp.broadcast_to((t_pos < valid).astype(jnp.float32), (B, T, 1))
        fpn_masks.append(m)

    outs = reg_head_forward(fpn_feats, fpn_masks, params, scales)
    outs = jax.block_until_ready(outs)

    # Verify against the pure-JAX reference of the PyTorch forward (bf16-matched).
    for l in range(fpn_levels):
        ref = _ref_level(fpn_feats[l], fpn_masks[l], params, scales[l])
        assert outs[l].shape == (B, Ts[l], 2)
        err = float(jnp.max(jnp.abs(outs[l] - ref)))
        assert jnp.allclose(outs[l], ref, atol=5e-3, rtol=5e-3), \
            f"level {l} mismatch, max abs err = {err:.3e}"

    print("KERNEL_OK")
</pallas_src>

<mosaic_0001>
module attributes {stable_mosaic.version = 11 : i64} {
  func.func @_reg_head_kernel(%arg0: i32, %arg1: memref<128x32xbf16, #tpu.memory_space<vmem>>, %arg2: memref<128x1xf32, #tpu.memory_space<vmem>>, %arg3: memref<128x1xf32, #tpu.memory_space<vmem>>, %arg4: memref<96x32xbf16, #tpu.memory_space<vmem>>, %arg5: memref<1x32xf32, #tpu.memory_space<vmem>>, %arg6: memref<96x32xbf16, #tpu.memory_space<vmem>>, %arg7: memref<1x32xf32, #tpu.memory_space<vmem>>, %arg8: memref<96x128xbf16, #tpu.memory_space<vmem>>, %arg9: memref<1x128xf32, #tpu.memory_space<vmem>>, %arg10: memref<128x128xf32, #tpu.memory_space<vmem>>) attributes {dimension_semantics = [#tpu.dimension_semantics<parallel>], iteration_bounds = array<i64: 1>, scalar_prefetch = 0 : i64, scratch_operands = 0 : i64, tpu.core_type = #tpu.core_type<tc>, window_params = [{transform_indices = @transform_0, window_bounds = array<i64: 128, 32>}, {transform_indices = @transform_1, window_bounds = array<i64: 128, 1>}, {transform_indices = @transform_2, window_bounds = array<i64: 128, 1>}, {pipeline_mode = #tpu.pipeline_mode<synchronous>, transform_indices = @transform_3, window_bounds = array<i64: 96, 32>}, {pipeline_mode = #tpu.pipeline_mode<synchronous>, transform_indices = @transform_4, window_bounds = array<i64: 1, 32>}, {pipeline_mode = #tpu.pipeline_mode<synchronous>, transform_indices = @transform_5, window_bounds = array<i64: 96, 32>}, {pipeline_mode = #tpu.pipeline_mode<synchronous>, transform_indices = @transform_6, window_bounds = array<i64: 1, 32>}, {pipeline_mode = #tpu.pipeline_mode<synchronous>, transform_indices = @transform_7, window_bounds = array<i64: 96, 128>}, {pipeline_mode = #tpu.pipeline_mode<synchronous>, transform_indices = @transform_8, window_bounds = array<i64: 1, 128>}, {transform_indices = @transform_9, window_bounds = array<i64: 128, 128>}]} {
    %c0 = arith.constant 0 : index
    %c0_0 = arith.constant 0 : index
    %0 = vector.load %arg1[%c0, %c0_0] : memref<128x32xbf16, #tpu.memory_space<vmem>>, vector<128x32xbf16>
    %1 = arith.extf %0 : vector<128x32xbf16> to vector<128x32xf32>
    %c0_1 = arith.constant 0 : index
    %c0_2 = arith.constant 0 : index
    %2 = vector.load %arg2[%c0_1, %c0_2] : memref<128x1xf32, #tpu.memory_space<vmem>>, vector<128x1xf32>
    %c0_3 = arith.constant 0 : index
    %c0_4 = arith.constant 0 : index
    %3 = vector.load %arg3[%c0_3, %c0_4] : memref<128x1xf32, #tpu.memory_space<vmem>>, vector<128x1xf32>
    %c1_i32 = arith.constant 1 : i32
    %4 = tpu.dynamic_rotate %1 by %c1_i32 dim 0 : vector<128x32xf32>, i32 -> vector<128x32xf32>
    %c127_i32 = arith.constant 127 : i32
    %5 = tpu.dynamic_rotate %1 by %c127_i32 dim 0 : vector<128x32xf32>, i32 -> vector<128x32xf32>
    %6 = tpu.concatenate %4, %1, %5 in 1 : vector<128x32xf32>, vector<128x32xf32>, vector<128x32xf32> -> vector<128x96xf32>
    %7 = arith.truncf %6 : vector<128x96xf32> to vector<128x96xbf16>
    %c0_5 = arith.constant 0 : index
    %c0_6 = arith.constant 0 : index
    %8 = vector.load %arg4[%c0_5, %c0_6] : memref<96x32xbf16, #tpu.memory_space<vmem>>, vector<96x32xbf16>
    %cst = arith.constant dense<0.000000e+00> : vector<128x32xf32>
    %9 = tpu.matmul %7, %8, %cst {dimension_numbers = #tpu.dot_dimension_numbers<[1], [0], [0], [1], [0, 0, 1, 1], [], []>} : vector<128x96xbf16>, vector<96x32xbf16>, vector<128x32xf32> -> vector<128x32xf32>
    %c0_7 = arith.constant 0 : index
    %c0_8 = arith.constant 0 : index
    %10 = vector.load %arg5[%c0_7, %c0_8] : memref<1x32xf32, #tpu.memory_space<vmem>>, vector<1x32xf32>
    %11 = vector.broadcast %10 : vector<1x32xf32> to vector<128x32xf32>
    %12 = arith.addf %9, %11 : vector<128x32xf32>
    %13 = vector.broadcast %2 : vector<128x1xf32> to vector<128x32xf32>
    %14 = arith.mulf %12, %13 : vector<128x32xf32>
    %cst_9 = arith.constant 0.000000e+00 : f32
    %15 = vector.broadcast %cst_9 : f32 to vector<128x32xf32>
    %16 = arith.maximumf %14, %15 : vector<128x32xf32>
    %c1_i32_10 = arith.constant 1 : i32
    %17 = tpu.dynamic_rotate %16 by %c1_i32_10 dim 0 : vector<128x32xf32>, i32 -> vector<128x32xf32>
    %c127_i32_11 = arith.constant 127 : i32
    %18 = tpu.dynamic_rotate %16 by %c127_i32_11 dim 0 : vector<128x32xf32>, i32 -> vector<128x32xf32>
    %19 = tpu.concatenate %17, %16, %18 in 1 : vector<128x32xf32>, vector<128x32xf32>, vector<128x32xf32> -> vector<128x96xf32>
    %20 = arith.truncf %19 : vector<128x96xf32> to vector<128x96xbf16>
    %c0_12 = arith.constant 0 : index
    %c0_13 = arith.constant 0 : index
    %21 = vector.load %arg6[%c0_12, %c0_13] : memref<96x32xbf16, #tpu.memory_space<vmem>>, vector<96x32xbf16>
    %cst_14 = arith.constant dense<0.000000e+00> : vector<128x32xf32>
    %22 = tpu.matmul %20, %21, %cst_14 {dimension_numbers = #tpu.dot_dimension_numbers<[1], [0], [0], [1], [0, 0, 1, 1], [], []>} : vector<128x96xbf16>, vector<96x32xbf16>, vector<128x32xf32> -> vector<128x32xf32>
    %c0_15 = arith.constant 0 : index
    %c0_16 = arith.constant 0 : index
    %23 = vector.load %arg7[%c0_15, %c0_16] : memref<1x32xf32, #tpu.memory_space<vmem>>, vector<1x32xf32>
    %24 = vector.broadcast %23 : vector<1x32xf32> to vector<128x32xf32>
    %25 = arith.addf %22, %24 : vector<128x32xf32>
    %26 = vector.broadcast %2 : vector<128x1xf32> to vector<128x32xf32>
    %27 = arith.mulf %25, %26 : vector<128x32xf32>
    %cst_17 = arith.constant 0.000000e+00 : f32
    %28 = vector.broadcast %cst_17 : f32 to vector<128x32xf32>
    %29 = arith.maximumf %27, %28 : vector<128x32xf32>
    %c1_i32_18 = arith.constant 1 : i32
    %30 = tpu.dynamic_rotate %29 by %c1_i32_18 dim 0 : vector<128x32xf32>, i32 -> vector<128x32xf32>
    %c127_i32_19 = arith.constant 127 : i32
    %31 = tpu.dynamic_rotate %29 by %c127_i32_19 dim 0 : vector<128x32xf32>, i32 -> vector<128x32xf32>
    %32 = tpu.concatenate %30, %29, %31 in 1 : vector<128x32xf32>, vector<128x32xf32>, vector<128x32xf32> -> vector<128x96xf32>
    %33 = arith.truncf %32 : vector<128x96xf32> to vector<128x96xbf16>
    %c0_20 = arith.constant 0 : index
    %c0_21 = arith.constant 0 : index
    %34 = vector.load %arg8[%c0_20, %c0_21] : memref<96x128xbf16, #tpu.memory_space<vmem>>, vector<96x128xbf16>
    %cst_22 = arith.constant dense<0.000000e+00> : vector<128x128xf32>
    %35 = tpu.matmul %33, %34, %cst_22 {dimension_numbers = #tpu.dot_dimension_numbers<[1], [0], [0], [1], [0, 0, 1, 1], [], []>} : vector<128x96xbf16>, vector<96x128xbf16>, vector<128x128xf32> -> vector<128x128xf32>
    %c0_23 = arith.constant 0 : index
    %c0_24 = arith.constant 0 : index
    %36 = vector.load %arg9[%c0_23, %c0_24] : memref<1x128xf32, #tpu.memory_space<vmem>>, vector<1x128xf32>
    %37 = vector.broadcast %36 : vector<1x128xf32> to vector<128x128xf32>
    %38 = arith.addf %35, %37 : vector<128x128xf32>
    %39 = vector.broadcast %3 : vector<128x1xf32> to vector<128x128xf32>
    %40 = arith.mulf %38, %39 : vector<128x128xf32>
    %cst_25 = arith.constant 0.000000e+00 : f32
    %41 = vector.broadcast %cst_25 : f32 to vector<128x128xf32>
    %42 = arith.maximumf %40, %41 : vector<128x128xf32>
    %c0_26 = arith.constant 0 : index
    %c0_27 = arith.constant 0 : index
    %43 = vector.load %arg10[%c0_26, %c0_27] : memref<128x128xf32, #tpu.memory_space<vmem>>, vector<128x128xf32>
    tpu.vector_store %arg10[%c0_26, %c0_27], %42 {strides = array<i32>} : memref<128x128xf32, #tpu.memory_space<vmem>>, vector<128x128xf32>,
    return
  }
  func.func @transform_0(%arg0: i32) -> (i32, i32) {
    %c0_i32 = arith.constant 0 : i32
    %c0_i32_0 = arith.constant 0 : i32
    return %arg0, %c0_i32 : i32, i32
  }
  func.func @transform_1(%arg0: i32) -> (i32, i32) {
    %c0_i32 = arith.constant 0 : i32
    %c0_i32_0 = arith.constant 0 : i32
    return %arg0, %c0_i32 : i32, i32
  }
  func.func @transform_2(%arg0: i32) -> (i32, i32) {
    %c0_i32 = arith.constant 0 : i32
    %c0_i32_0 = arith.constant 0 : i32
    return %arg0, %c0_i32 : i32, i32
  }
  func.func @transform_3(%arg0: i32) -> (i32, i32) {
    %c0_i32 = arith.constant 0 : i32
    %c0_i32_0 = arith.constant 0 : i32
    %c0_i32_1 = arith.constant 0 : i32
    return %c0_i32, %c0_i32_0 : i32, i32
  }
  func.func @transform_4(%arg0: i32) -> (i32, i32) {
    %c0_i32 = arith.constant 0 : i32
    %c0_i32_0 = arith.constant 0 : i32
    %c0_i32_1 = arith.constant 0 : i32
    return %c0_i32, %c0_i32_0 : i32, i32
  }
  func.func @transform_5(%arg0: i32) -> (i32, i32) {
    %c0_i32 = arith.constant 0 : i32
    %c0_i32_0 = arith.constant 0 : i32
    %c0_i32_1 = arith.constant 0 : i32
    return %c0_i32, %c0_i32_0 : i32, i32
  }
  func.func @transform_6(%arg0: i32) -> (i32, i32) {
    %c0_i32 = arith.constant 0 : i32
    %c0_i32_0 = arith.constant 0 : i32
    %c0_i32_1 = arith.constant 0 : i32
    return %c0_i32, %c0_i32_0 : i32, i32
  }
  func.func @transform_7(%arg0: i32) -> (i32, i32) {
    %c0_i32 = arith.constant 0 : i32
    %c0_i32_0 = arith.constant 0 : i32
    %c0_i32_1 = arith.constant 0 : i32
    return %c0_i32, %c0_i32_0 : i32, i32
  }
  func.func @transform_8(%arg0: i32) -> (i32, i32) {
    %c0_i32 = arith.constant 0 : i32
    %c0_i32_0 = arith.constant 0 : i32
    %c0_i32_1 = arith.constant 0 : i32
    return %c0_i32, %c0_i32_0 : i32, i32
  }
  func.func @transform_9(%arg0: i32) -> (i32, i32) {
    %c0_i32 = arith.constant 0 : i32
    %c0_i32_0 = arith.constant 0 : i32
    return %arg0, %c0_i32 : i32, i32
  }
}

</mosaic_0001>

<bundles_post_ra>
// kernel: tpu_custom_call.1
= control target key start
LH: loop header
LB: loop body
LE: loop exit
PB: predicated region body
PF: predicated region fallthrough
CT: control target
= control target key end

     0   :  { %v114_v2 = vlaneseq  ;;  %s2129_s21 = smov 32   ;;  %s2130_s30 = smov 64   ;;  %s3177_s0 = inlined_call_operand.vmem [shape: bf16[128,32], index: 0, kind: input, shape index: {}]   ;;  %s3178_s1 = inlined_call_operand.vmem [shape: f32[128,1], index: 1, kind: input, shape index: {}]   ;;  %s3179_s2 = inlined_call_operand.vmem [shape: f32[128,1], index: 2, kind: input, shape index: {}]   ;;  %s3180_s3 = inlined_call_operand.vmem [shape: bf16[96,32], index: 3, kind: input, shape index: {}]   ;;  %s3181_s4 = inlined_call_operand.vmem [shape: f32[1,32], index: 4, kind: input, shape index: {}]   ;;  %s3182_s5 = inlined_call_operand.vmem [shape: bf16[96,32], index: 5, kind: input, shape index: {}]   ;;  %s3183_s6 = inlined_call_operand.vmem [shape: f32[1,32], index: 6, kind: input, shape index: {}]   ;;  %s3184_s7 = inlined_call_operand.vmem [shape: bf16[96,128], index: 7, kind: input, shape index: {}]   ;;  %s3185_s8 = inlined_call_operand.vmem [shape: f32[1,128], index: 8, kind: input, shape index: {}]   ;;  %s3186_s9 = inlined_call_operand.hbm [shape: f32[128,128], index: 9, kind: output, shape index: {}]  }
   0x1   :  { %v1663_v0 = vld [vmem:[%s3177_s0] sm:$0xff]   ;;  %v1694_v1 = vld [vmem:[%s3177_s0 + $0x8] sm:$0xff]   ;;  %v1695_v3 = vld [vmem:[%s3177_s0 + $0x10] sm:$0xff]  }
   0x2   :  { %v2194_v4 = vunpack.c.l.bf16 %v1663_v0  ;;  %v2196_v5 = vunpack.c.h.bf16 %v1663_v0  ;;  %v2198_v6 = vunpack.c.l.bf16 %v1694_v1  ;;  %v2200_v7 = vunpack.c.h.bf16 %v1694_v1  ;;  %v1696_v8 = vld [vmem:[%s3177_s0 + $0x18] sm:$0xff]   ;;  %v2087_v15 = vld [vmem:[%s3180_s3] sm:$0xff]   ;;  %v1698_v22 = vld [vmem:[%s3177_s0 + $0x28] sm:$0xff]  }
   0x3   :  { %v2205_v9 = vshrl.u32 %v114_v2, 7  ;;  %v2207_v10 = vunpack.c.l.bf16 %v1695_v3  ;;  %v2209_v11 = vunpack.c.h.bf16 %v1695_v3  ;;  %v2214_v14 = vunpack.c.l.bf16 %v1696_v8  ;;  %v1697_v18 = vld [vmem:[%s3177_s0 + $0x20] sm:$0xff]   ;;  %1743 = vmatprep.subr.bf16.mxu0 %v2087_v15  ;;  %v2088_v23 = vld [vmem:[%s3180_s3 + $0x8] sm:$0xff]   ;;  %v1699_v28 = vld [vmem:[%s3177_s0 + $0x30] sm:$0xff]  }
   0x4   :  { %v1845_v12 = vpack.i.bf16 %v2196_v5, %v2194_v4  ;;  %v133_v13 = vrot.slane %v2194_v4, 1  ;;  %v134_v16 = vrot.slane %v2196_v5, 1  ;;  %v135_v17 = vrot.slane %v2198_v6, 1  ;;  %1744 = vmatpush3.bf16.msra.mxu0 %v2087_v15  ;;  %v2089_v33 = vld [vmem:[%s3180_s3 + $0x10] sm:$0xff]   ;;  %v2090_v39 = vld [vmem:[%s3180_s3 + $0x18] sm:$0xff]   ;;  %v2091_v53 = vld [vmem:[%s3180_s3 + $0x20] sm:$0xff]  }
   0x5   :  { %vm149_vm0 = vcmp.lt.s32.totalorder %v2205_v9, 7  ;;  %v1850_v19 = vpack.i.bf16 %v2200_v7, %v2198_v6  ;;  %v136_v20 = vrot.slane %v2200_v7, 1  ;;  %v137_v21 = vrot.slane %v2207_v10, 1  ;;  %1745 = vmatprep.subr.bf16.mxu0 %v2088_v23  ;;  %v1700_v49 = vld [vmem:[%s3177_s0 + $0x38] sm:$0xff]  }
   0x6   :  { %1846 = vrot.lane.b32.xlu0 %v1845_v12, %s2129_s21  ;;  %v163_v24 = vsel %vm149_vm0, %v134_v16, %v135_v17  ;;  %v164_v25 = vsel %vm149_vm0, %v133_v13, %v134_v16  ;;  %v2242_v26 = vunpack.c.h.bf16 %v1696_v8  ;;  %v138_v27 = vrot.slane %v2209_v11, 1  ;;  %v2092_v12 = vld [vmem:[%s3180_s3 + $0x28] sm:$0xff]  }
   0x7   :  { %v1860_v29 = vpack.i.bf16 %v163_v24, %v164_v25  ;;  %v161_v30 = vsel %vm149_vm0, %v136_v20, %v137_v21  ;;  %v162_v31 = vsel %vm149_vm0, %v135_v17, %v136_v20  ;;  %v139_v32 = vrot.slane %v2214_v14, 1 }
   0x8   :  { %v2256_v34 = vunpack.c.l.bf16 %v1697_v18  ;;  %v1865_v35 = vpack.i.bf16 %v161_v30, %v162_v31  ;;  %v1855_v36 = vpack.i.bf16 %v2209_v11, %v2207_v10  ;;  %v2262_v37 = vunpack.c.h.bf16 %v1697_v18  ;;  %1746 = vmatpush3.bf16.msra.mxu0 %v2088_v23 }
   0x9   :  { %1861 = vrot.lane.b32.xlu1 %v1860_v29, %s2130_s30  ;;  %v2264_v38 = vunpack.c.l.bf16 %v1698_v22  ;;  %v159_v40 = vsel %vm149_vm0, %v138_v27, %v139_v32  ;;  %v160_v41 = vsel %vm149_vm0, %v137_v21, %v138_v27  ;;  %v140_v42 = vrot.slane %v2242_v26, 1  ;;  %1747 = vmatprep.subr.bf16.mxu0 %v2089_v33 }
   0xa   :  { %1851 = vrot.lane.b32.xlu0 %v1850_v19, %s2129_s21  ;;  %v141_v43 = vrot.slane %v2256_v34, 1  ;;  %v2275_v44 = vunpack.c.h.bf16 %v1698_v22  ;;  %v142_v45 = vrot.slane %v2262_v37, 1  ;;  %v2279_v47 = vunpack.c.l.bf16 %v1699_v28 }
   0xb   :  { %v143_v46 = vrot.slane %v2264_v38, 1  ;;  %v99_v48 = vrot.slane %v2196_v5, 7  ;;  %v98_v50 = vrot.slane %v2194_v4, 7  ;;  %vm116_vm1 = vcmp.lt.s32.totalorder %v2205_v9, 1 }
   0xc   :  { %v1870_v51 = vpack.i.bf16 %v2242_v26, %v2214_v14  ;;  %v1875_v52 = vpack.i.bf16 %v159_v40, %v160_v41  ;;  %v157_v54 = vsel %vm149_vm0, %v140_v42, %v141_v43  ;;  %v158_v55 = vsel %vm149_vm0, %v139_v32, %v140_v42  ;;  %1748 = vmatpush3.bf16.msra.mxu0 %v2089_v33 }
   0xd   :  { %1866 = vrot.lane.b32.xlu1 %v1865_v35, %s2130_s30  ;;  %v1885_v56 = vpack.i.bf16 %v2262_v37, %v2256_v34  ;;  %v155_v57 = vsel %vm149_vm0, %v142_v45, %v143_v46  ;;  %v144_v58 = vrot.slane %v2275_v44, 1  ;;  %v145_v59 = vrot.slane %v2279_v47, 1  ;;  %1749 = vmatprep.subr.bf16.mxu0 %v2090_v39 }
   0xe   :  { %1856 = vrot.lane.b32.xlu0 %v1855_v36, %s2129_s21  ;;  %v156_v60 = vsel %vm149_vm0, %v141_v43, %v142_v45  ;;  %v1689_v61 = vunpack.c.h.bf16 %v1699_v28  ;;  %v100_v62 = vrot.slane %v2198_v6, 7  ;;  %v101_v63 = vrot.slane %v2200_v7, 7 }
   0xf   :  { %v1880_v0 = vpack.i.bf16 %v157_v54, %v158_v55  ;;  %v1890_v1 = vpack.i.bf16 %v2275_v44, %v2264_v38  ;;  %v1692_v2 = vunpack.c.l.bf16 %v1700_v49  ;;  %v102_v3 = vrot.slane %v2207_v10, 7 }
  0x10   :  { %v1693_v5 = vunpack.c.h.bf16 %v1700_v49  ;;  %1750 = vmatpush3.bf16.msra.mxu0 %v2090_v39  ;;  %v2315_v8 = vsel %vm116_vm1, %v100_v62, %v101_v63  ;;  %v2319_v6 = vsel %vm116_vm1, %v99_v48, %v100_v62  ;;  %v103_v7 = vrot.slane %v2209_v11, 7 }
  0x11   :  { %1871 = vrot.lane.b32.xlu1 %v1870_v51, %s2129_s21  ;;  %v1895_v15 = vpack.i.bf16 %v155_v57, %v156_v60  ;;  %v153_v10 = vsel %vm149_vm0, %v144_v58, %v145_v59  ;;  %v154_v16 = vsel %vm149_vm0, %v143_v46, %v144_v58  ;;  %1751 = vmatprep.subr.bf16.mxu0 %v2091_v53  ;;  %v146_v18 = vrot.slane %v1689_v61, 1 }
  0x12   :  { %1876 = vrot.lane.b32.xlu0 %v1875_v52, %s2130_s30  ;;  %v2331_v17 = vsel %vm116_vm1, %v101_v63, %v102_v3  ;;  %v2335_v11 = vsel %vm116_vm1, %v102_v3, %v103_v7  ;;  %v113_v19 = vrot.slane %v1693_v5, 7  ;;  %v2339_v20 = vsel %vm116_vm1, %v98_v50, %v99_v48 }
  0x13   :  { %v147_v21 = vrot.slane %v1692_v2, 1  ;;  %v104_v22 = vrot.slane %v2214_v14, 7  ;;  %v105_v23 = vrot.slane %v2242_v26, 7  ;;  %v106_v24 = vrot.slane %v2256_v34, 7 }
  0x14   :  { %1752 = vmatpush3.bf16.msra.mxu0 %v2091_v53  ;;  %v2348_v25 = vsel %vm116_vm1, %v113_v19, %v98_v50  ;;  %v107_v27 = vrot.slane %v2262_v37, 7  ;;  %v108_v28 = vrot.slane %v2264_v38, 7  ;;  %v109_v29 = vrot.slane %v2275_v44, 7 }
  0x15   :  { %1881 = vrot.lane.b32.xlu1 %v1880_v0, %s2130_s30 }
  0x16   :  { %1886 = vrot.lane.b32.xlu0 %v1885_v56, %s2129_s21 }
  0x17   :  { %14 = vsyncpa [#allocation3], 0  ;;  %1753 = vmatprep.subr.bf16.mxu0 %v2092_v12  ;;  %v2355_v14 = vsel %vm116_vm1, %v104_v22, %v105_v23  ;;  %v2359_v26 = vsel %vm116_vm1, %v103_v7, %v104_v22  ;;  %v2363_v30 = vsel %vm116_vm1, %v105_v23, %v106_v24  ;;  %v110_v31 = vrot.slane %v2279_v47, 7  ;;  %v66_v52 = vld [vmem:[%s3178_s1] sm:$0xff]  ;;  %v67_v4 = vld [vmem:[%s3178_s1 + $0x8] sm:$0xff] }
  0x18   :  { %v2368_v32 = vsel %vm116_vm1, %v106_v24, %v107_v27  ;;  %v2372_v33 = vsel %vm116_vm1, %v108_v28, %v109_v29  ;;  %v2376_v34 = vsel %vm116_vm1, %v107_v27, %v108_v28  ;;  %v111_v35 = vrot.slane %v1689_v61, 7  ;;  %1754 = vmatpush3.bf16.msra.mxu0 %v2092_v12  ;;  %v68_v53 = vld [vmem:[%s3178_s1 + $0x10] sm:$0xff]  ;;  %v71_v54 = vld [vmem:[%s3178_s1 + $0x28] sm:$0xff]  ;;  %v70_v55 = vld [vmem:[%s3178_s1 + $0x20] sm:$0xff] }
  0x19   :  { %1891 = vrot.lane.b32.xlu1 %v1890_v1, %s2129_s21  ;;  %v1900_v36 = vpack.i.bf16 %v153_v10, %v154_v16  ;;  %v1905_v37 = vpack.i.bf16 %v1689_v61, %v2279_v47  ;;  %v2383_v38 = vsel %vm116_vm1, %v109_v29, %v110_v31  ;;  %v112_v39 = vrot.slane %v1692_v2, 7  ;;  %v73_v56 = vld [vmem:[%s3178_s1 + $0x38] sm:$0xff]  ;;  %v72_v57 = vld [vmem:[%s3178_s1 + $0x30] sm:$0xff]  ;;  %v75_v58 = vld [vmem:[%s3178_s1 + $0x48] sm:$0xff] }
  0x1a   :  { %1896 = vrot.lane.b32.xlu0 %v1895_v15, %s2130_s30  ;;  %v151_v40 = vsel %vm149_vm0, %v146_v18, %v147_v21  ;;  %v152_v41 = vsel %vm149_vm0, %v145_v59, %v146_v18  ;;  %v148_v42 = vrot.slane %v1693_v5, 1  ;;  %v2391_v43 = vsel %vm116_vm1, %v110_v31, %v111_v35  ;;  %v74_v59 = vld [vmem:[%s3178_s1 + $0x40] sm:$0xff]  ;;  %v77_v60 = vld [vmem:[%s3178_s1 + $0x58] sm:$0xff]  ;;  %v76_v61 = vld [vmem:[%s3178_s1 + $0x50] sm:$0xff] }
  0x1b   :  { %v2395_v44 = vsel %vm116_vm1, %v112_v39, %v113_v19  ;;  %v2399_v45 = vsel %vm116_vm1, %v111_v35, %v112_v39  ;;  %v1910_v46 = vpack.i.bf16 %v1693_v5, %v1692_v2  ;;  %v1915_v47 = vpack.i.bf16 %v151_v40, %v152_v41  ;;  %v79_v62 = vld [vmem:[%s3178_s1 + $0x68] sm:$0xff]  ;;  %v78_v63 = vld [vmem:[%s3178_s1 + $0x60] sm:$0xff]  ;;  %v81_v0 = vld [vmem:[%s3178_s1 + $0x78] sm:$0xff] }
  0x1c   :  { %v150_v48 = vsel %vm149_vm0, %v147_v21, %v148_v42  ;;  %v165_v49 = vsel %vm149_vm0, %v148_v42, %v133_v13  ;;  %v2131_v50 = vmov 0   ;;  %v69_v13 = vld [vmem:[%s3178_s1 + $0x18] sm:$0xff]  ;;  %v80_v1 = vld [vmem:[%s3178_s1 + $0x70] sm:$0xff]  ;;  %vm294_vm2 = vcmask 261120   ;;  %v86_v9 = vld [vmem:[%s3179_s2 + $0x20] sm:$0xff] }
  0x1d   :  { %1901 = vrot.lane.b32.xlu1 %v1900_v36, %s2130_s30  ;;  %1925 = vset.pattern.permute.xlu0 %v2131_v50  ;;  %v1920_v51 = vpack.i.bf16 %v165_v49, %v150_v48  ;;  %vm311_vm3 = vcmask 523264   ;;  %vm391_vm4 = vcmask 785408  }
  0x1e   :  { %1906 = vrot.lane.b32.xlu0 %v1905_v37, %s2129_s21  ;;  %1926 = vset.pattern.permute.xlu1 %v2131_v50 }
  0x21   :  { %1911 = vrot.lane.b32.xlu1 %v1910_v46, %s2129_s21 }
  0x22   :  { %1916 = vrot.lane.b32.xlu0 %v1915_v47, %s2130_s30 }
  0x25   :  { %1921 = vrot.lane.b32.xlu1 %v1920_v51, %s2130_s30 }
  0x26   :  { %515 = vperm.xlu0 %1925, %v66_v52  }
  0x29   :  { %520 = vperm.xlu1 %1926, %v67_v4  }
  0x2a   :  { %530 = vperm.xlu0 %1925, %v69_v13  }
  0x2d   :  { %525 = vperm.xlu1 %1926, %v68_v53  }
  0x2e   :  { %540 = vperm.xlu0 %1925, %v71_v54  }
  0x31   :  { %535 = vperm.xlu1 %1926, %v70_v55  }
  0x32   :  { %550 = vperm.xlu0 %1925, %v73_v56  }
  0x35   :  { %545 = vperm.xlu1 %1926, %v72_v57  }
  0x36   :  { %560 = vperm.xlu0 %1925, %v75_v58  }
  0x39   :  { %555 = vperm.xlu1 %1926, %v74_v59  }
  0x3a   :  { %570 = vperm.xlu0 %1925, %v77_v60  }
  0x3d   :  { %565 = vperm.xlu1 %1926, %v76_v61  }
  0x3e   :  { %580 = vperm.xlu0 %1925, %v79_v62  }
  0x41   :  { %575 = vperm.xlu1 %1926, %v78_v63  }
  0x42   :  { %590 = vperm.xlu0 %1925, %v81_v0  }
  0x45   :  { %585 = vperm.xlu1 %1926, %v80_v1  }
  0x78   :  { %v1847_v2 = vpop.permute.xlu0 %1846 }
  0x79   :  { %v1849_v3 = vunpack.i.h.bf16 %v1847_v2  ;;  %v1848_v5 = vunpack.i.l.bf16 %v1847_v2 }
  0x7b   :  { %v1862_v7 = vpop.permute.xlu1 %1861  ;;  %v295_v15 = vsel %vm294_vm2, %v2348_v25, %v1848_v5  ;;  %v296_v10 = vsel %vm294_vm2, %v2339_v20, %v1849_v3 }
  0x7c   :  { %v1852_v12 = vpop.permute.xlu0 %1851  ;;  %v1864_v16 = vunpack.i.h.bf16 %v1862_v7  ;;  %v1863_v18 = vunpack.i.l.bf16 %v1862_v7 }
  0x7d   :  { %v1854_v19 = vunpack.i.h.bf16 %v1852_v12  ;;  %v1853_v21 = vunpack.i.l.bf16 %v1852_v12 }
  0x7e   :  { %v312_v22 = vsel %vm311_vm3, %v295_v15, %v1863_v18  ;;  %v313_v23 = vsel %vm311_vm3, %v296_v10, %v1864_v16 }
  0x7f   :  { %v298_v24 = vsel %vm294_vm2, %v2315_v8, %v1854_v19  ;;  %v297_v27 = vsel %vm294_vm2, %v2319_v6, %v1853_v21  ;;  %v1867_v28 = vpop.permute.xlu1 %1866  ;;  %v328_v29 = vpack.c.bf16 %v313_v23, %v312_v22 }
  0x80   :  { %v1857_v25 = vpop.permute.xlu0 %1856  ;;  %v1869_v31 = vunpack.i.h.bf16 %v1867_v28  ;;  %v1868_v20 = vunpack.i.l.bf16 %v1867_v28 }
  0x81   :  { %v1859_v35 = vunpack.i.h.bf16 %v1857_v25  ;;  %v1858_v36 = vunpack.i.l.bf16 %v1857_v25  ;;  %1755 = vmatprep.mubr.msk.bf16.mxu0 %vm391_vm4, %v328_v29 }
  0x82   :  { %v315_v37 = vsel %vm311_vm3, %v298_v24, %v1869_v31  ;;  %v314_v39 = vsel %vm311_vm3, %v297_v27, %v1868_v20 }
  0x83   :  { %v329_v40 = vpack.c.bf16 %v315_v37, %v314_v39  ;;  %v300_v8 = vsel %vm294_vm2, %v2335_v11, %v1859_v35  ;;  %v299_v6 = vsel %vm294_vm2, %v2331_v17, %v1858_v36  ;;  %v1872_v41 = vpop.permute.xlu1 %1871 }
  0x84   :  { %v1877_v42 = vpop.permute.xlu0 %1876  ;;  %v1874_v48 = vunpack.i.h.bf16 %v1872_v41  ;;  %v1873_v49 = vunpack.i.l.bf16 %v1872_v41  ;;  %v2093_v41 = vld [vmem:[%s3182_s5] sm:$0xff]  }
  0x85   :  { %v1879_v46 = vunpack.i.h.bf16 %v1877_v42  ;;  %v1878_v47 = vunpack.i.l.bf16 %v1877_v42  ;;  %1756 = vmatmul.mubr.msk.bf16.vlgmr.msra.gmra.mrb[0].mxu0 %vm391_vm4, %v329_v40  ;;  %1771 = vmatprep.subr.bf16.mxu1 %v2093_v41 }
  0x86   :  { %v302_v17 = vsel %vm294_vm2, %v2355_v14, %v1874_v48  ;;  %v301_v56 = vsel %vm294_vm2, %v2359_v26, %v1873_v49  ;;  %1772 = vmatpush3.bf16.msra.mxu1 %v2093_v41 }
  0x87   :  { %v316_v50 = vsel %vm311_vm3, %v299_v6, %v1878_v47  ;;  %v317_v51 = vsel %vm311_vm3, %v300_v8, %v1879_v46  ;;  %v1882_v4 = vpop.permute.xlu1 %1881 }
  0x88   :  { %v330_v52 = vpack.c.bf16 %v317_v51, %v316_v50  ;;  %v1887_v13 = vpop.permute.xlu0 %1886  ;;  %v1884_v53 = vunpack.i.h.bf16 %v1882_v4  ;;  %v1883_v11 = vunpack.i.l.bf16 %v1882_v4  ;;  %v2540_v51 = vld [vmem:[%s3181_s4] ss:$0 sm:$0xff]  ;;  %v2096_v4 = vld [vmem:[%s3182_s5 + $0x18] sm:$0xff]  }
  0x89   :  { %v1889_v54 = vunpack.i.h.bf16 %v1887_v13  ;;  %v1888_v55 = vunpack.i.l.bf16 %v1887_v13 }
  0x8a   :  { %1759 = vmatprep.mubr.msk.bf16.mxu0 %vm391_vm4, %v330_v52  ;;  %v318_v57 = vsel %vm311_vm3, %v301_v56, %v1883_v11  ;;  %v319_v58 = vsel %vm311_vm3, %v302_v17, %v1884_v53 }
  0x8b   :  { %v331_v59 = vpack.c.bf16 %v319_v58, %v318_v57  ;;  %v304_v60 = vsel %vm294_vm2, %v2368_v32, %v1889_v54  ;;  %v303_v61 = vsel %vm294_vm2, %v2363_v30, %v1888_v55  ;;  %v1892_v62 = vpop.permute.xlu1 %1891  ;;  %v2097_v58 = vld [vmem:[%s3182_s5 + $0x20] sm:$0xff]  }
  0x8c   :  { %v1897_v63 = vpop.permute.xlu0 %1896  ;;  %v1894_v1 = vunpack.i.h.bf16 %v1892_v62  ;;  %v1893_v2 = vunpack.i.l.bf16 %v1892_v62 }
  0x8d   :  { %v1899_v0 = vunpack.i.h.bf16 %v1897_v63  ;;  %v1898_v14 = vunpack.i.l.bf16 %v1897_v63  ;;  %1760 = vmatmul.mubr.msk.bf16.gmra.mrb[4].mxu0 %vm391_vm4, %v331_v59 }
  0x8e   :  { %v306_v30 = vsel %vm294_vm2, %v2372_v33, %v1894_v1  ;;  %v305_v18 = vsel %vm294_vm2, %v2376_v34, %v1893_v2 }
  0x8f   :  { %v320_v26 = vsel %vm311_vm3, %v303_v61, %v1898_v14  ;;  %v321_v3 = vsel %vm311_vm3, %v304_v60, %v1899_v0  ;;  %v1902_v7 = vpop.permute.xlu1 %1901 }
  0x90   :  { %v332_v5 = vpack.c.bf16 %v321_v3, %v320_v26  ;;  %v1907_v12 = vpop.permute.xlu0 %1906  ;;  %v1904_v15 = vunpack.i.h.bf16 %v1902_v7  ;;  %v1903_v32 = vunpack.i.l.bf16 %v1902_v7 }
  0x91   :  { %v1909_v10 = vunpack.i.h.bf16 %v1907_v12  ;;  %v1908_v16 = vunpack.i.l.bf16 %v1907_v12 }
  0x92   :  { %1763 = vmatprep.mubr.msk.bf16.mxu0 %vm391_vm4, %v332_v5  ;;  %v322_v19 = vsel %vm311_vm3, %v305_v18, %v1903_v32  ;;  %v323_v21 = vsel %vm311_vm3, %v306_v30, %v1904_v15 }
  0x93   :  { %v333_v22 = vpack.c.bf16 %v323_v21, %v322_v19  ;;  %v308_v23 = vsel %vm294_vm2, %v2391_v43, %v1909_v10  ;;  %v307_v24 = vsel %vm294_vm2, %v2383_v38, %v1908_v16  ;;  %v1912_v27 = vpop.permute.xlu1 %1911 }
  0x94   :  { %v1917_v28 = vpop.permute.xlu0 %1916  ;;  %v1914_v29 = vunpack.i.h.bf16 %v1912_v27  ;;  %v1913_v31 = vunpack.i.l.bf16 %v1912_v27 }
  0x95   :  { %v1919_v25 = vunpack.i.h.bf16 %v1917_v28  ;;  %v1918_v33 = vunpack.i.l.bf16 %v1917_v28  ;;  %1764 = vmatmul.mubr.msk.bf16.gmra.mrb[8].mxu0 %vm391_vm4, %v333_v22 }
  0x96   :  { %v310_v43 = vsel %vm294_vm2, %v2395_v44, %v1914_v29  ;;  %v309_v38 = vsel %vm294_vm2, %v2399_v45, %v1913_v31  ;;  %v2094_v44 = vld [vmem:[%s3182_s5 + $0x8] sm:$0xff]   ;;  %v2095_v45 = vld [vmem:[%s3182_s5 + $0x10] sm:$0xff]  }
  0x97   :  { %v324_v34 = vsel %vm311_vm3, %v307_v24, %v1918_v33  ;;  %v325_v20 = vsel %vm311_vm3, %v308_v23, %v1919_v25  ;;  %v1922_v36 = vpop.permute.xlu1 %1921  ;;  %1773 = vmatprep.subr.bf16.mxu1 %v2094_v44 }
  0x98   :  { %v334_v35 = vpack.c.bf16 %v325_v20, %v324_v34  ;;  %v1924_v37 = vunpack.i.h.bf16 %v1922_v36  ;;  %v1923_v39 = vunpack.i.l.bf16 %v1922_v36  ;;  %1774 = vmatpush3.bf16.msra.mxu1 %v2094_v44  ;;  %v2098_v34 = vld [vmem:[%s3182_s5 + $0x28] sm:$0xff]  }
  0x99   :  { %1775 = vmatprep.subr.bf16.mxu1 %v2095_v45 }
  0x9a   :  { %1767 = vmatprep.mubr.msk.bf16.mxu0 %vm391_vm4, %v334_v35  ;;  %v326_v40 = vsel %vm311_vm3, %v309_v38, %v1923_v39  ;;  %v327_v8 = vsel %vm311_vm3, %v310_v43, %v1924_v37 }
  0x9b   :  { %v335_v6 = vpack.c.bf16 %v327_v8, %v326_v40 }
  0x9c   :  { %1776 = vmatpush3.bf16.msra.mxu1 %v2095_v45 }
  0x9d   :  { %1768 = vmatmul.mubr.msk.bf16.gmra.mrb[12].mxu0 %vm391_vm4, %v335_v6  ;;  %1777 = vmatprep.subr.bf16.mxu1 %v2096_v4 }
  0xa0   :  { %1778 = vmatpush3.bf16.msra.mxu1 %v2096_v4 }
  0xa1   :  { %1779 = vmatprep.subr.bf16.mxu1 %v2097_v58 }
  0xa4   :  { %1780 = vmatpush3.bf16.msra.mxu1 %v2097_v58 }
  0xa5   :  { %v2527_v46 = vpop.permute.xlu0 %515  ;;  %1781 = vmatprep.subr.bf16.mxu1 %v2098_v34 }
  0xa8   :  { %v2525_v42 = vpop.permute.xlu1 %520  ;;  %1782 = vmatpush3.bf16.msra.mxu1 %v2098_v34 }
  0xa9   :  { %v2531_v48 = vpop.permute.xlu0 %530 }
  0xac   :  { %v2529_v47 = vpop.permute.xlu1 %525 }
  0xad   :  { %v2535_v50 = vpop.permute.xlu0 %540 }
  0xb0   :  { %v2533_v49 = vpop.permute.xlu1 %535 }
  0xb1   :  { %v2554_v59 = vpop.permute.xlu0 %550 }
  0xb4   :  { %v2546_v11 = vpop.permute.xlu1 %545 }
  0xb5   :  { %v2572_v19 = vpop.permute.xlu0 %560 }
  0xb8   :  { %v2564_v26 = vpop.permute.xlu1 %555 }
  0xb9   :  { %v2618_v4 = vpop.permute.xlu0 %570 }
  0xbc   :  { %v2606_v8 = vpop.permute.xlu1 %565 }
  0xbd   :  { %v2650_v34 = vpop.permute.xlu0 %580 }
 0x158   :  { %v1757_v52 = vpop.f32.mrb[0].mxu0 }
 0x159   :  { %v459_v13 = vadd.f32 %v1757_v52, %v2540_v51  ;;  %v450_v53 = vpop.f32.mrb[1].mxu0 }
 0x15a   :  { %v451_v54 = vadd.f32 %v2540_v51, %v450_v53  ;;  %v1758_v55 = vpop.f32.mrb[2].mxu0 }
 0x15b   :  { %v595_v17 = vmul.f32 %v2529_v47, %v459_v13  ;;  %v462_v56 = vadd.f32 %v1758_v55, %v2540_v51  ;;  %v453_v57 = vpop.f32.mrb[3].mxu0 }
 0x15c   :  { %v593_v60 = vmul.f32 %v2527_v46, %v451_v54  ;;  %v454_v61 = vadd.f32 %v2540_v51, %v453_v57 }
 0x15d   :  { %v611_v62 = vmax.f32 %v595_v17, 0.0  ;;  %v596_v63 = vmul.f32 %v2531_v48, %v462_v56 }
 0x15e   :  { %v2559_v0 = vmax.f32 %v593_v60, 0.0  ;;  %v594_v14 = vmul.f32 %v2525_v42, %v454_v61 }
 0x15f   :  { %v627_v1 = vrot.slane %v611_v62, 7  ;;  %v2562_v2 = vmax.f32 %v596_v63, 0.0  ;;  %v659_v3 = vrot.slane %v611_v62, 1 }
 0x160   :  { %v625_v5 = vrot.slane %v2559_v0, 7  ;;  %v657_v7 = vrot.slane %v2559_v0, 1  ;;  %v610_v12 = vmax.f32 %v594_v14, 0.0  ;;  %v1761_v15 = vpop.f32.mrb[4].mxu0 }
 0x161   :  { %v628_v32 = vrot.slane %v2562_v2, 7  ;;  %v660_v10 = vrot.slane %v2562_v2, 1  ;;  %v475_v16 = vadd.f32 %v1761_v15, %v2540_v51  ;;  %v466_v30 = vpop.f32.mrb[5].mxu0  ;;  %v1927_v18 = vpack.i.bf16 %v2562_v2, %v611_v62 }
 0x162   :  { %v626_v21 = vrot.slane %v610_v12, 7  ;;  %v658_v22 = vrot.slane %v610_v12, 1  ;;  %v467_v23 = vadd.f32 %v2540_v51, %v466_v30  ;;  %v1762_v24 = vpop.f32.mrb[6].mxu0  ;;  %v1932_v27 = vpack.i.bf16 %v610_v12, %v2559_v0 }
 0x163   :  { %v599_v28 = vmul.f32 %v2546_v11, %v475_v16  ;;  %v478_v25 = vadd.f32 %v1762_v24, %v2540_v51  ;;  %1928 = vrot.lane.b32.xlu0 %v1927_v18, %s2129_s21  ;;  %v469_v33 = vpop.f32.mrb[7].mxu0  ;;  %v685_v29 = vsel %vm149_vm0, %v659_v3, %v660_v10  ;;  %v2585_v31 = vsel %vm116_vm1, %v627_v1, %v628_v32 }
 0x164   :  { %v597_v20 = vmul.f32 %v2533_v49, %v467_v23  ;;  %v470_v35 = vadd.f32 %v2540_v51, %v469_v33  ;;  %1933 = vrot.lane.b32.xlu1 %v1932_v27, %s2129_s21  ;;  %v686_v36 = vsel %vm149_vm0, %v658_v22, %v659_v3  ;;  %v687_v37 = vsel %vm149_vm0, %v657_v7, %v658_v22 }
 0x165   :  { %v2599_v39 = vmax.f32 %v599_v28, 0.0  ;;  %v600_v43 = vmul.f32 %v2554_v59, %v478_v25  ;;  %v1937_v38 = vpack.i.bf16 %v686_v36, %v687_v37  ;;  %v2604_v40 = vsel %vm116_vm1, %v626_v21, %v627_v1 }
 0x166   :  { %v613_v6 = vmax.f32 %v597_v20, 0.0  ;;  %v598_v41 = vmul.f32 %v2535_v50, %v470_v35  ;;  %v2613_v44 = vsel %vm116_vm1, %v625_v5, %v626_v21  ;;  %v2634_v21 = vpop.permute.xlu1 %575 }
 0x167   :  { %v631_v45 = vrot.slane %v2599_v39, 7  ;;  %v2616_v52 = vmax.f32 %v600_v43, 0.0  ;;  %v663_v13 = vrot.slane %v2599_v39, 1 }
 0x168   :  { %v629_v53 = vrot.slane %v613_v6, 7  ;;  %v661_v54 = vrot.slane %v613_v6, 1  ;;  %v614_v55 = vmax.f32 %v598_v41, 0.0  ;;  %v1765_v17 = vpop.f32.mrb[8].mxu0  ;;  %1938 = vrot.lane.b32.xlu1 %v1937_v38, %s2130_s30 }
 0x169   :  { %v632_v56 = vrot.slane %v2616_v52, 7  ;;  %v664_v57 = vrot.slane %v2616_v52, 1  ;;  %v491_v58 = vadd.f32 %v1765_v17, %v2540_v51  ;;  %v482_v60 = vpop.f32.mrb[9].mxu0  ;;  %v1952_v61 = vpack.i.bf16 %v2616_v52, %v2599_v39 }
 0x16a   :  { %v630_v62 = vrot.slane %v614_v55, 7  ;;  %v662_v63 = vrot.slane %v614_v55, 1  ;;  %v483_v14 = vadd.f32 %v2540_v51, %v482_v60  ;;  %v1766_v1 = vpop.f32.mrb[10].mxu0  ;;  %v1942_v3 = vpack.i.bf16 %v614_v55, %v613_v6  ;;  %v2680_v60 = vpop.permute.xlu1 %585 }
 0x16b   :  { %v603_v12 = vmul.f32 %v2606_v8, %v491_v58  ;;  %v494_v15 = vadd.f32 %v1766_v1, %v2540_v51  ;;  %v485_v16 = vpop.f32.mrb[11].mxu0  ;;  %v684_v30 = vsel %vm149_vm0, %v660_v10, %v661_v54  ;;  %v681_v18 = vsel %vm149_vm0, %v663_v13, %v664_v57 }
 0x16c   :  { %v601_v22 = vmul.f32 %v2564_v26, %v483_v14  ;;  %v486_v23 = vadd.f32 %v2540_v51, %v485_v16  ;;  %1943 = vrot.lane.b32.xlu1 %v1942_v3, %s2129_s21  ;;  %v1947_v24 = vpack.i.bf16 %v684_v30, %v685_v29  ;;  %v682_v27 = vsel %vm149_vm0, %v662_v63, %v663_v13 }
 0x16d   :  { %v2641_v28 = vmax.f32 %v603_v12, 0.0  ;;  %v604_v25 = vmul.f32 %v2618_v4, %v494_v15  ;;  %v683_v10 = vsel %vm149_vm0, %v661_v54, %v662_v63  ;;  %v2648_v33 = vsel %vm116_vm1, %v629_v53, %v630_v62 }
 0x16e   :  { %v617_v20 = vmax.f32 %v601_v22, 0.0  ;;  %v602_v35 = vmul.f32 %v2572_v19, %v486_v23  ;;  %1948 = vrot.lane.b32.xlu0 %v1947_v24, %s2130_s30  ;;  %v1957_v29 = vpack.i.bf16 %v682_v27, %v683_v10  ;;  %v2658_v36 = vsel %vm116_vm1, %v628_v32, %v629_v53  ;;  %v2690_v22 = vpop.permute.xlu0 %590 }
 0x16f   :  { %v635_v37 = vrot.slane %v2641_v28, 7  ;;  %v667_v39 = vrot.slane %v2641_v28, 1  ;;  %v2662_v43 = vmax.f32 %v604_v25, 0.0  ;;  %v2668_v38 = vsel %vm116_vm1, %v631_v45, %v632_v56 }
 0x170   :  { %v633_v6 = vrot.slane %v617_v20, 7  ;;  %v665_v41 = vrot.slane %v617_v20, 1  ;;  %v618_v13 = vmax.f32 %v602_v35, 0.0  ;;  %v1769_v2 = vpop.f32.mrb[12].mxu0  ;;  %1958 = vrot.lane.b32.xlu1 %v1957_v29, %s2130_s30  ;;  %v2673_v32 = vsel %vm116_vm1, %v630_v62, %v631_v45 }
 0x171   :  { %v636_v53 = vrot.slane %v2662_v43, 7  ;;  %v668_v54 = vrot.slane %v2662_v43, 1  ;;  %v507_v55 = vadd.f32 %v1769_v2, %v2540_v51  ;;  %v498_v17 = vpop.f32.mrb[13].mxu0  ;;  %v1972_v58 = vpack.i.bf16 %v2662_v43, %v2641_v28 }
 0x172   :  { %v634_v63 = vrot.slane %v618_v13, 7  ;;  %v666_v14 = vrot.slane %v618_v13, 1  ;;  %v499_v1 = vadd.f32 %v2540_v51, %v498_v17  ;;  %1953 = vrot.lane.b32.xlu0 %v1952_v61, %s2129_s21  ;;  %v1770_v45 = vpop.f32.mrb[14].mxu0  ;;  %v1962_v62 = vpack.i.bf16 %v618_v13, %v617_v20 }
 0x173   :  { %v607_v3 = vmul.f32 %v2680_v60, %v507_v55  ;;  %v510_v12 = vadd.f32 %v1770_v45, %v2540_v51  ;;  %v501_v15 = vpop.f32.mrb[15].mxu0  ;;  %v680_v16 = vsel %vm149_vm0, %v664_v57, %v665_v41  ;;  %v677_v30 = vsel %vm149_vm0, %v667_v39, %v668_v54 }
 0x174   :  { %v605_v23 = vmul.f32 %v2634_v21, %v499_v1  ;;  %v502_v24 = vadd.f32 %v2540_v51, %v501_v15  ;;  %1963 = vrot.lane.b32.xlu1 %v1962_v62, %s2129_s21  ;;  %v1967_v61 = vpack.i.bf16 %v680_v16, %v681_v18  ;;  %v678_v27 = vsel %vm149_vm0, %v666_v14, %v667_v39 }
 0x175   :  { %v623_v28 = vmax.f32 %v607_v3, 0.0  ;;  %v608_v25 = vmul.f32 %v2690_v22, %v510_v12  ;;  %v679_v57 = vsel %vm149_vm0, %v665_v41, %v666_v14  ;;  %v2702_v10 = vsel %vm116_vm1, %v633_v6, %v634_v63 }
 0x176   :  { %v621_v20 = vmax.f32 %v605_v23, 0.0  ;;  %v606_v35 = vmul.f32 %v2650_v34, %v502_v24  ;;  %1968 = vrot.lane.b32.xlu0 %v1967_v61, %s2130_s30  ;;  %v1977_v51 = vpack.i.bf16 %v678_v27, %v679_v57  ;;  %v2710_v18 = vsel %vm116_vm1, %v632_v56, %v633_v6 }
 0x177   :  { %v639_v29 = vrot.slane %v623_v28, 7  ;;  %v624_v39 = vmax.f32 %v608_v25, 0.0  ;;  %v2714_v43 = vsel %vm116_vm1, %v635_v37, %v636_v53  ;;  %v671_v41 = vrot.slane %v623_v28, 1 }
 0x178   :  { %v669_v13 = vrot.slane %v621_v20, 1  ;;  %v622_v2 = vmax.f32 %v606_v35, 0.0  ;;  %1978 = vrot.lane.b32.xlu1 %v1977_v51, %s2130_s30  ;;  %v2719_v55 = vsel %vm116_vm1, %v634_v63, %v635_v37  ;;  %v637_v52 = vrot.slane %v621_v20, 7 }
 0x179   :  { %v640_v17 = vrot.slane %v624_v39, 7  ;;  %v672_v14 = vrot.slane %v624_v39, 1  ;;  %v1992_v56 = vpack.i.bf16 %v624_v39, %v623_v28 }
 0x17a   :  { %v638_v6 = vrot.slane %v622_v2, 7  ;;  %v670_v1 = vrot.slane %v622_v2, 1  ;;  %1973 = vrot.lane.b32.xlu0 %v1972_v58, %s2129_s21  ;;  %v1982_v45 = vpack.i.bf16 %v622_v2, %v621_v20  ;;  %v676_v62 = vsel %vm149_vm0, %v668_v54, %v669_v13 }
 0x17b   :  { %v1987_v3 = vpack.i.bf16 %v676_v62, %v677_v30  ;;  %v673_v12 = vsel %vm149_vm0, %v671_v41, %v672_v14  ;;  %v688_v37 = vsel %vm149_vm0, %v672_v14, %v657_v7  ;;  %v656_v63 = vsel %vm116_vm1, %v640_v17, %v625_v5 }
 0x17c   :  { %1983 = vrot.lane.b32.xlu1 %v1982_v45, %s2129_s21  ;;  %v674_v58 = vsel %vm149_vm0, %v670_v1, %v671_v41  ;;  %v675_v54 = vsel %vm149_vm0, %v669_v13, %v670_v1  ;;  %v2002_v15 = vpack.i.bf16 %v688_v37, %v673_v12  ;;  %v2741_v16 = vsel %vm116_vm1, %v637_v52, %v638_v6 }
 0x17d   :  { %v1997_v30 = vpack.i.bf16 %v674_v58, %v675_v54  ;;  %v2745_v0 = vsel %vm116_vm1, %v636_v53, %v637_v52  ;;  %v2749_v5 = vsel %vm116_vm1, %v639_v29, %v640_v17  ;;  %v2753_v7 = vsel %vm116_vm1, %v638_v6, %v639_v29 }
 0x17e   :  { %1988 = vrot.lane.b32.xlu0 %v1987_v3, %s2130_s30 }
 0x180   :  { %1998 = vrot.lane.b32.xlu1 %v1997_v30, %s2130_s30 }
 0x182   :  { %1993 = vrot.lane.b32.xlu0 %v1992_v56, %s2129_s21 }
 0x186   :  { %2003 = vrot.lane.b32.xlu0 %v2002_v15, %s2130_s30 }
 0x1d5   :  { %v1929_v27 = vpop.permute.xlu0 %1928 }
 0x1d6   :  { %v1934_v23 = vpop.permute.xlu1 %1933  ;;  %v1931_v29 = vunpack.i.h.bf16 %v1929_v27  ;;  %v1930_v39 = vunpack.i.l.bf16 %v1929_v27 }
 0x1d7   :  { %v1936_v24 = vunpack.i.h.bf16 %v1934_v23  ;;  %v1935_v53 = vunpack.i.l.bf16 %v1934_v23 }
 0x1d8   :  { %v819_v6 = vsel %vm294_vm2, %v2604_v40, %v1930_v39 }
 0x1d9   :  { %v817_v57 = vsel %vm294_vm2, %v656_v63, %v1935_v53  ;;  %v818_v20 = vsel %vm294_vm2, %v2613_v44, %v1936_v24  ;;  %v820_v44 = vsel %vm294_vm2, %v2585_v31, %v1931_v29 }
 0x1da   :  { %v1939_v61 = vpop.permute.xlu1 %1938 }
 0x1db   :  { %v1941_v28 = vunpack.i.h.bf16 %v1939_v61  ;;  %v1940_v25 = vunpack.i.l.bf16 %v1939_v61 }
 0x1dd   :  { %v833_v35 = vsel %vm311_vm3, %v817_v57, %v1940_v25  ;;  %v834_v51 = vsel %vm311_vm3, %v818_v20, %v1941_v28 }
 0x1de   :  { %v1944_v41 = vpop.permute.xlu1 %1943  ;;  %v849_v13 = vpack.c.bf16 %v834_v51, %v833_v35 }
 0x1df   :  { %v1946_v2 = vunpack.i.h.bf16 %v1944_v41  ;;  %v1945_v52 = vunpack.i.l.bf16 %v1944_v41 }
 0x1e0   :  { %v1949_v17 = vpop.permute.xlu0 %1948  ;;  %1783 = vmatprep.mubr.msk.bf16.mxu1 %vm391_vm4, %v849_v13 }
 0x1e1   :  { %v1951_v14 = vunpack.i.h.bf16 %v1949_v17  ;;  %v1950_v56 = vunpack.i.l.bf16 %v1949_v17  ;;  %v822_v37 = vsel %vm294_vm2, %v2648_v33, %v1946_v2  ;;  %v821_v63 = vsel %vm294_vm2, %v2658_v36, %v1945_v52 }
 0x1e2   :  { %v1959_v1 = vpop.permute.xlu1 %1958 }
 0x1e3   :  { %v836_v45 = vsel %vm311_vm3, %v820_v44, %v1951_v14  ;;  %v835_v62 = vsel %vm311_vm3, %v819_v6, %v1950_v56  ;;  %v1961_v3 = vunpack.i.h.bf16 %v1959_v1  ;;  %v1960_v12 = vunpack.i.l.bf16 %v1959_v1 }
 0x1e4   :  { %v850_v58 = vpack.c.bf16 %v836_v45, %v835_v62  ;;  %v1954_v54 = vpop.permute.xlu0 %1953 }
 0x1e5   :  { %v837_v40 = vsel %vm311_vm3, %v821_v63, %v1960_v12  ;;  %v838_v15 = vsel %vm311_vm3, %v822_v37, %v1961_v3  ;;  %v1956_v30 = vunpack.i.h.bf16 %v1954_v54  ;;  %v1955_v23 = vunpack.i.l.bf16 %v1954_v54 }
 0x1e6   :  { %v851_v31 = vpack.c.bf16 %v838_v15, %v837_v40  ;;  %1784 = vmatmul.mubr.msk.bf16.vlgmr.msra.gmra.mrb[0].mxu1 %vm391_vm4, %v850_v58  ;;  %v1964_v24 = vpop.permute.xlu1 %1963 }
 0x1e7   :  { %v1966_v53 = vunpack.i.h.bf16 %v1964_v24  ;;  %v1965_v61 = vunpack.i.l.bf16 %v1964_v24  ;;  %v824_v36 = vsel %vm294_vm2, %v2668_v38, %v1956_v30  ;;  %v823_v25 = vsel %vm294_vm2, %v2673_v32, %v1955_v23 }
 0x1e8   :  { %v1969_v27 = vpop.permute.xlu0 %1968  ;;  %1787 = vmatprep.mubr.msk.bf16.mxu1 %vm391_vm4, %v851_v31 }
 0x1e9   :  { %v1971_v33 = vunpack.i.h.bf16 %v1969_v27  ;;  %v1970_v28 = vunpack.i.l.bf16 %v1969_v27  ;;  %v826_v39 = vsel %vm294_vm2, %v2702_v10, %v1966_v53  ;;  %v825_v41 = vsel %vm294_vm2, %v2710_v18, %v1965_v61 }
 0x1ea   :  { %v1979_v57 = vpop.permute.xlu1 %1978 }
 0x1eb   :  { %v839_v20 = vsel %vm311_vm3, %v823_v25, %v1970_v28  ;;  %v840_v35 = vsel %vm311_vm3, %v824_v36, %v1971_v33  ;;  %v1981_v51 = vunpack.i.h.bf16 %v1979_v57  ;;  %v1980_v29 = vunpack.i.l.bf16 %v1979_v57  ;;  %v2817_v25 = vld [vmem:[%s3183_s6] ss:$0 sm:$0xff] }
 0x1ec   :  { %v852_v13 = vpack.c.bf16 %v840_v35, %v839_v20  ;;  %v1974_v2 = vpop.permute.xlu0 %1973 }
 0x1ed   :  { %v841_v38 = vsel %vm311_vm3, %v825_v41, %v1980_v29  ;;  %v842_v52 = vsel %vm311_vm3, %v826_v39, %v1981_v51  ;;  %v1976_v17 = vunpack.i.h.bf16 %v1974_v2  ;;  %v1975_v14 = vunpack.i.l.bf16 %v1974_v2 }
 0x1ee   :  { %v853_v32 = vpack.c.bf16 %v842_v52, %v841_v38  ;;  %1788 = vmatmul.mubr.msk.bf16.gmra.mrb[4].mxu1 %vm391_vm4, %v852_v13  ;;  %v1984_v56 = vpop.permute.xlu1 %1983  ;;  %v2100_v38 = vld [vmem:[%s3184_s7 + $0x8] sm:$0xff]  }
 0x1ef   :  { %v1986_v6 = vunpack.i.h.bf16 %v1984_v56  ;;  %v1985_v44 = vunpack.i.l.bf16 %v1984_v56  ;;  %v828_v18 = vsel %vm294_vm2, %v2714_v43, %v1976_v17  ;;  %v827_v62 = vsel %vm294_vm2, %v2719_v55, %v1975_v14 }
 0x1f0   :  { %v1989_v1 = vpop.permute.xlu0 %1988  ;;  %1791 = vmatprep.mubr.msk.bf16.mxu1 %vm391_vm4, %v853_v32 }
 0x1f1   :  { %v1991_v10 = vunpack.i.h.bf16 %v1989_v1  ;;  %v1990_v45 = vunpack.i.l.bf16 %v1989_v1  ;;  %v830_v54 = vsel %vm294_vm2, %v2741_v16, %v1986_v6  ;;  %v829_v40 = vsel %vm294_vm2, %v2745_v0, %v1985_v44 }
 0x1f2   :  { %v1999_v3 = vpop.permute.xlu1 %1998 }
 0x1f3   :  { %v843_v12 = vsel %vm311_vm3, %v827_v62, %v1990_v45  ;;  %v844_v37 = vsel %vm311_vm3, %v828_v18, %v1991_v10  ;;  %v2001_v63 = vunpack.i.h.bf16 %v1999_v3  ;;  %v2000_v58 = vunpack.i.l.bf16 %v1999_v3 }
 0x1f4   :  { %v854_v15 = vpack.c.bf16 %v844_v37, %v843_v12  ;;  %v1994_v31 = vpop.permute.xlu0 %1993 }
 0x1f5   :  { %v845_v43 = vsel %vm311_vm3, %v829_v40, %v2000_v58  ;;  %v846_v30 = vsel %vm311_vm3, %v830_v54, %v2001_v63  ;;  %v1996_v23 = vunpack.i.h.bf16 %v1994_v31  ;;  %v1995_v24 = vunpack.i.l.bf16 %v1994_v31 }
 0x1f6   :  { %v855_v55 = vpack.c.bf16 %v846_v30, %v845_v43  ;;  %1792 = vmatmul.mubr.msk.bf16.gmra.mrb[8].mxu1 %vm391_vm4, %v854_v15 }
 0x1f7   :  { %v832_v16 = vsel %vm294_vm2, %v2749_v5, %v1996_v23  ;;  %v831_v0 = vsel %vm294_vm2, %v2753_v7, %v1995_v24  ;;  %v2099_v5 = vld [vmem:[%s3184_s7] sm:$0xff]  }
 0x1f8   :  { %v2004_v53 = vpop.permute.xlu0 %2003  ;;  %1795 = vmatprep.mubr.msk.bf16.mxu1 %vm391_vm4, %v855_v55  ;;  %1799 = vmatprep.subr.bf16.mxu0 %v2099_v5 }
 0x1f9   :  { %v2006_v61 = vunpack.i.h.bf16 %v2004_v53  ;;  %v2005_v27 = vunpack.i.l.bf16 %v2004_v53  ;;  %1827 = vmatprep.subr.bf16.mxu1 %v2099_v5  ;;  %1800 = vmatpush3.bf16.msra.mxu0 %v2099_v5  ;;  %v2102_v53 = vld [vmem:[%s3184_s7 + $0x18] sm:$0xff]  }
 0x1fa   :  { %1833 = vmatpush3.bf16.msra.mxu1 %v2099_v5  ;;  %1801 = vmatprep.subr.bf16.mxu0 %v2100_v38 }
 0x1fb   :  { %v848_v33 = vsel %vm311_vm3, %v832_v16, %v2006_v61  ;;  %v847_v28 = vsel %vm311_vm3, %v831_v0, %v2005_v27  ;;  %1828 = vmatprep.subr.bf16.mxu1 %v2100_v38 }
 0x1fc   :  { %v856_v36 = vpack.c.bf16 %v848_v33, %v847_v28 }
 0x1fd   :  { %1802 = vmatpush3.bf16.msra.mxu0 %v2100_v38 }
 0x1fe   :  { %1796 = vmatmul.mubr.msk.bf16.gmra.mrb[12].mxu1 %vm391_vm4, %v856_v36 }
 0x1ff   :  { %1834 = vmatpush3.bf16.msra.mxu1 %v2100_v38 }
 0x2b9   :  { %v1785_v57 = vpop.f32.mrb[0].mxu1 }
 0x2ba   :  { %v979_v20 = vadd.f32 %v1785_v57, %v2817_v25  ;;  %v970_v7 = vpop.f32.mrb[1].mxu1 }
 0x2bb   :  { %v971_v35 = vadd.f32 %v2817_v25, %v970_v7  ;;  %v1786_v51 = vpop.f32.mrb[2].mxu1 }
 0x2bc   :  { %v1035_v29 = vmul.f32 %v979_v20, %v2529_v47  ;;  %v982_v39 = vadd.f32 %v1786_v51, %v2817_v25  ;;  %v973_v41 = vpop.f32.mrb[3].mxu1 }
 0x2bd   :  { %v1033_v13 = vmul.f32 %v971_v35, %v2527_v46  ;;  %v974_v2 = vadd.f32 %v2817_v25, %v973_v41  ;;  %v2103_v35 = vld [vmem:[%s3184_s7 + $0x20] sm:$0xff]  }
 0x2be   :  { %v1051_v52 = vmax.f32 %v1035_v29, 0.0  ;;  %v1036_v32 = vmul.f32 %v982_v39, %v2531_v48  ;;  %v2101_v48 = vld [vmem:[%s3184_s7 + $0x10] sm:$0xff]  }
 0x2bf   :  { %v2832_v17 = vmax.f32 %v1033_v13, 0.0  ;;  %v1034_v47 = vmul.f32 %v974_v2, %v2525_v42  ;;  %1803 = vmatprep.subr.bf16.mxu0 %v2101_v48  ;;  %1829 = vmatprep.subr.bf16.mxu1 %v2101_v48 }
 0x2c0   :  { %v1067_v14 = vrot.slane %v1051_v52, 7  ;;  %v2835_v56 = vmax.f32 %v1036_v32, 0.0  ;;  %v1099_v46 = vrot.slane %v1051_v52, 1  ;;  %1804 = vmatpush3.bf16.msra.mxu0 %v2101_v48  ;;  %1835 = vmatpush3.bf16.msra.mxu1 %v2101_v48 }
 0x2c1   :  { %v1065_v6 = vrot.slane %v2832_v17, 7  ;;  %v1097_v44 = vrot.slane %v2832_v17, 1  ;;  %v1050_v1 = vmax.f32 %v1034_v47, 0.0  ;;  %v1789_v10 = vpop.f32.mrb[4].mxu1  ;;  %1805 = vmatprep.subr.bf16.mxu0 %v2102_v53  ;;  %1830 = vmatprep.subr.bf16.mxu1 %v2102_v53 }
 0x2c2   :  { %v1068_v42 = vrot.slane %v2835_v56, 7  ;;  %v1100_v45 = vrot.slane %v2835_v56, 1  ;;  %v995_v18 = vadd.f32 %v1789_v10, %v2817_v25  ;;  %v986_v62 = vpop.f32.mrb[5].mxu1  ;;  %v2007_v3 = vpack.i.bf16 %v2835_v56, %v1051_v52 }
 0x2c3   :  { %v1066_v12 = vrot.slane %v1050_v1, 7  ;;  %v1098_v37 = vrot.slane %v1050_v1, 1  ;;  %v987_v63 = vadd.f32 %v2817_v25, %v986_v62  ;;  %v1790_v58 = vpop.f32.mrb[6].mxu1  ;;  %v2012_v54 = vpack.i.bf16 %v1050_v1, %v2832_v17  ;;  %v82_v17 = vld [vmem:[%s3179_s2] sm:$0xff] }
 0x2c4   :  { %v1039_v40 = vmul.f32 %v995_v18, %v2546_v11  ;;  %v998_v15 = vadd.f32 %v1790_v58, %v2817_v25  ;;  %2008 = vrot.lane.b32.xlu1 %v2007_v3, %s2129_s21  ;;  %v989_v31 = vpop.f32.mrb[7].mxu1  ;;  %v2853_v43 = vsel %vm149_vm0, %v1099_v46, %v1100_v45  ;;  %v2859_v30 = vsel %vm116_vm1, %v1067_v14, %v1068_v42 }
 0x2c5   :  { %v1037_v55 = vmul.f32 %v987_v63, %v2533_v49  ;;  %v990_v23 = vadd.f32 %v2817_v25, %v989_v31  ;;  %v1126_v11 = vsel %vm149_vm0, %v1098_v37, %v1099_v46  ;;  %v1127_v24 = vsel %vm149_vm0, %v1097_v44, %v1098_v37  ;;  %1806 = vmatpush3.bf16.msra.mxu0 %v2102_v53  ;;  %v2104_v63 = vld [vmem:[%s3184_s7 + $0x28] sm:$0xff]  }
 0x2c6   :  { %v1055_v61 = vmax.f32 %v1039_v40, 0.0  ;;  %v1040_v27 = vmul.f32 %v998_v15, %v2554_v59  ;;  %v2017_v16 = vpack.i.bf16 %v1126_v11, %v1127_v24  ;;  %v2875_v49 = vsel %vm116_vm1, %v1066_v12, %v1067_v14  ;;  %1836 = vmatpush3.bf16.msra.mxu1 %v2102_v53  ;;  %1807 = vmatprep.subr.bf16.mxu0 %v2103_v35 }
 0x2c7   :  { %v2877_v0 = vmax.f32 %v1037_v55, 0.0  ;;  %v1038_v33 = vmul.f32 %v990_v23, %v2535_v50  ;;  %v2884_v28 = vsel %vm116_vm1, %v1065_v6, %v1066_v12  ;;  %1831 = vmatprep.subr.bf16.mxu1 %v2103_v35 }
 0x2c8   :  { %v1071_v36 = vrot.slane %v1055_v61, 7  ;;  %v2886_v59 = vmax.f32 %v1040_v27, 0.0  ;;  %2013 = vrot.lane.b32.xlu1 %v2012_v54, %s2129_s21  ;;  %v1103_v57 = vrot.slane %v1055_v61, 1 }
 0x2c9   :  { %v1069_v5 = vrot.slane %v2877_v0, 7  ;;  %v1101_v20 = vrot.slane %v2877_v0, 1  ;;  %v2891_v7 = vmax.f32 %v1038_v33, 0.0  ;;  %v1793_v50 = vpop.f32.mrb[8].mxu1  ;;  %1808 = vmatpush3.bf16.msra.mxu0 %v2103_v35 }
 0x2ca   :  { %v1072_v51 = vrot.slane %v2886_v59, 7  ;;  %v1104_v29 = vrot.slane %v2886_v59, 1  ;;  %v1011_v39 = vadd.f32 %v1793_v50, %v2817_v25  ;;  %v1002_v41 = vpop.f32.mrb[9].mxu1  ;;  %v2022_v13 = vpack.i.bf16 %v2886_v59, %v1055_v61  ;;  %1837 = vmatpush3.bf16.msra.mxu1 %v2103_v35  ;;  %1809 = vmatprep.subr.bf16.mxu0 %v2104_v63 }
 0x2cb   :  { %v1070_v2 = vrot.slane %v2891_v7, 7  ;;  %v1102_v38 = vrot.slane %v2891_v7, 1  ;;  %v1003_v52 = vadd.f32 %v2817_v25, %v1002_v41  ;;  %v1794_v32 = vpop.f32.mrb[10].mxu1  ;;  %v2027_v47 = vpack.i.bf16 %v2891_v7, %v2877_v0  ;;  %1832 = vmatprep.subr.bf16.mxu1 %v2104_v63 }
 0x2cc   :  { %v1043_v14 = vmul.f32 %v1011_v39, %v2606_v8  ;;  %v1014_v46 = vadd.f32 %v1794_v32, %v2817_v25  ;;  %v1005_v1 = vpop.f32.mrb[11].mxu1  ;;  %2018 = vrot.lane.b32.xlu1 %v2017_v16, %s2130_s30  ;;  %v1124_v10 = vsel %vm149_vm0, %v1100_v45, %v1101_v20  ;;  %v2914_v48 = vsel %vm149_vm0, %v1103_v57, %v1104_v29 }
 0x2cd   :  { %v1041_v18 = vmul.f32 %v1003_v52, %v2564_v26  ;;  %v1006_v62 = vadd.f32 %v2817_v25, %v1005_v1  ;;  %v2032_v8 = vpack.i.bf16 %v1124_v10, %v2853_v43  ;;  %v2921_v3 = vsel %vm149_vm0, %v1102_v38, %v1103_v57  ;;  %1810 = vmatpush3.bf16.msra.mxu0 %v2104_v63 }
 0x2ce   :  { %v1059_v12 = vmax.f32 %v1043_v14, 0.0  ;;  %v1044_v45 = vmul.f32 %v1014_v46, %v2618_v4  ;;  %v2926_v37 = vsel %vm149_vm0, %v1101_v20, %v1102_v38  ;;  %v2932_v26 = vsel %vm116_vm1, %v1071_v36, %v1072_v51  ;;  %1838 = vmatpush3.bf16.msra.mxu1 %v2104_v63 }
 0x2cf   :  { %v1057_v58 = vmax.f32 %v1041_v18, 0.0  ;;  %v1042_v54 = vmul.f32 %v1006_v62, %v2572_v19  ;;  %v2037_v4 = vpack.i.bf16 %v2921_v3, %v2926_v37  ;;  %v2942_v40 = vsel %vm116_vm1, %v1070_v2, %v1071_v36 }
 0x2d0   :  { %v1075_v15 = vrot.slane %v1059_v12, 7  ;;  %v2944_v31 = vmax.f32 %v1044_v45, 0.0  ;;  %2023 = vrot.lane.b32.xlu1 %v2022_v13, %s2129_s21  ;;  %v2949_v43 = vsel %vm116_vm1, %v1069_v5, %v1070_v2  ;;  %v1107_v55 = vrot.slane %v1059_v12, 1 }
 0x2d1   :  { %v1105_v23 = vrot.slane %v1057_v58, 1  ;;  %v1058_v19 = vmax.f32 %v1042_v54, 0.0  ;;  %v1797_v11 = vpop.f32.mrb[12].mxu1  ;;  %v2955_v24 = vsel %vm116_vm1, %v1068_v42, %v1069_v5  ;;  %v1073_v53 = vrot.slane %v1057_v58, 7 }
 0x2d2   :  { %v1076_v61 = vrot.slane %v2944_v31, 7  ;;  %v1027_v27 = vadd.f32 %v1797_v11, %v2817_v25  ;;  %v1018_v16 = vpop.f32.mrb[13].mxu1  ;;  %v2042_v0 = vpack.i.bf16 %v2944_v31, %v1059_v12  ;;  %v1108_v33 = vrot.slane %v2944_v31, 1 }
 0x2d3   :  { %v1106_v36 = vrot.slane %v1058_v19, 1  ;;  %v1019_v56 = vadd.f32 %v2817_v25, %v1018_v16  ;;  %v1798_v57 = vpop.f32.mrb[14].mxu1  ;;  %v2047_v20 = vpack.i.bf16 %v1058_v19, %v1057_v58  ;;  %v1074_v42 = vrot.slane %v1058_v19, 7  ;;  %v90_v16 = vld [vmem:[%s3179_s2 + $0x40] sm:$0xff] }
 0x2d4   :  { %v1047_v5 = vmul.f32 %v1027_v27, %v2680_v60  ;;  %v1030_v7 = vadd.f32 %v1798_v57, %v2817_v25  ;;  %2043 = vrot.lane.b32.xlu0 %v2042_v0, %s2129_s21  ;;  %v1021_v50 = vpop.f32.mrb[15].mxu1  ;;  %2028 = vrot.lane.b32.xlu1 %v2027_v47, %s2129_s21  ;;  %v1120_v35 = vsel %vm149_vm0, %v1104_v29, %v1105_v23  ;;  %v83_v27 = vld [vmem:[%s3179_s2 + $0x8] sm:$0xff]  ;;  %v85_v0 = vld [vmem:[%s3179_s2 + $0x18] sm:$0xff] }
 0x2d5   :  { %v1045_v39 = vmul.f32 %v1019_v56, %v2634_v21  ;;  %v1022_v41 = vadd.f32 %v2817_v25, %v1021_v50  ;;  %v1118_v13 = vsel %vm149_vm0, %v1106_v36, %v1107_v55  ;;  %v1119_v60 = vsel %vm149_vm0, %v1105_v23, %v1106_v36  ;;  %v87_v36 = vld [vmem:[%s3179_s2 + $0x28] sm:$0xff]  ;;  %v94_v56 = vld [vmem:[%s3179_s2 + $0x60] sm:$0xff]  ;;  %v89_v57 = vld [vmem:[%s3179_s2 + $0x38] sm:$0xff] }
 0x2d6   :  { %v1063_v2 = vmax.f32 %v1047_v5, 0.0  ;;  %v1048_v38 = vmul.f32 %v1030_v7, %v2690_v22  ;;  %v2057_v52 = vpack.i.bf16 %v1118_v13, %v1119_v60  ;;  %v2052_v32 = vpack.i.bf16 %v1120_v35, %v2914_v48  ;;  %v93_v5 = vld [vmem:[%s3179_s2 + $0x58] sm:$0xff]  ;;  %v95_v7 = vld [vmem:[%s3179_s2 + $0x68] sm:$0xff] }
 0x2d7   :  { %v1061_v47 = vmax.f32 %v1045_v39, 0.0  ;;  %v1046_v14 = vmul.f32 %v1022_v41, %v2650_v34  ;;  %v1117_v21 = vsel %vm149_vm0, %v1107_v55, %v1108_v33  ;;  %v2983_v25 = vsel %vm116_vm1, %v1075_v15, %v1076_v61  ;;  %v97_v50 = vld [vmem:[%s3179_s2 + $0x78] sm:$0xff] }
 0x2d8   :  { %v1111_v29 = vrot.slane %v1063_v2, 1  ;;  %v1064_v46 = vmax.f32 %v1048_v38, 0.0  ;;  %2048 = vrot.lane.b32.xlu0 %v2047_v20, %s2129_s21  ;;  %2033 = vrot.lane.b32.xlu1 %v2032_v8, %s2130_s30  ;;  %v2989_v22 = vsel %vm116_vm1, %v1074_v42, %v1075_v15  ;;  %v2993_v48 = vsel %vm116_vm1, %v1073_v53, %v1074_v42  ;;  %v96_v20 = vld [vmem:[%s3179_s2 + $0x70] sm:$0xff]  ;;  %v91_v42 = vld [vmem:[%s3179_s2 + $0x48] sm:$0xff] }
 0x2d9   :  { %v1077_v1 = vrot.slane %v1061_v47, 7  ;;  %v1109_v10 = vrot.slane %v1061_v47, 1  ;;  %v1062_v34 = vmax.f32 %v1046_v14, 0.0  ;;  %v2999_v12 = vsel %vm116_vm1, %v1072_v51, %v1073_v53 }
 0x2da   :  { %v1080_v18 = vrot.slane %v1064_v46, 7  ;;  %v1112_v62 = vrot.slane %v1064_v46, 1  ;;  %v2062_v3 = vpack.i.bf16 %v1064_v46, %v1063_v2  ;;  %v1079_v58 = vrot.slane %v1063_v2, 7 }
 0x2db   :  { %v1078_v8 = vrot.slane %v1062_v34, 7  ;;  %v1110_v45 = vrot.slane %v1062_v34, 1  ;;  %v2067_v37 = vpack.i.bf16 %v1062_v34, %v1061_v47  ;;  %v1116_v63 = vsel %vm149_vm0, %v1108_v33, %v1109_v10  ;;  %v92_v33 = vld [vmem:[%s3179_s2 + $0x50] sm:$0xff] }
 0x2dc   :  { %2058 = vrot.lane.b32.xlu0 %v2057_v52, %s2130_s30  ;;  %2038 = vrot.lane.b32.xlu1 %v2037_v4, %s2130_s30  ;;  %v2072_v54 = vpack.i.bf16 %v1116_v63, %v1117_v21  ;;  %v1113_v15 = vsel %vm149_vm0, %v1111_v29, %v1112_v62  ;;  %v1128_v59 = vsel %vm149_vm0, %v1112_v62, %v1097_v44 }
 0x2dd   :  { %v1114_v51 = vsel %vm149_vm0, %v1110_v45, %v1111_v29  ;;  %v1115_v31 = vsel %vm149_vm0, %v1109_v10, %v1110_v45  ;;  %v2082_v55 = vpack.i.bf16 %v1128_v59, %v1113_v15  ;;  %v1096_v4 = vsel %vm116_vm1, %v1080_v18, %v1065_v6  ;;  %v84_v6 = vld [vmem:[%s3179_s2 + $0x10] sm:$0xff] }
 0x2de   :  { %v2077_v23 = vpack.i.bf16 %v1114_v51, %v1115_v31  ;;  %v3021_v19 = vsel %vm116_vm1, %v1079_v58, %v1080_v18  ;;  %v3025_v44 = vsel %vm116_vm1, %v1078_v8, %v1079_v58  ;;  %v3029_v11 = vsel %vm116_vm1, %v1077_v1, %v1078_v8 }
 0x2df   :  { %v3033_v53 = vsel %vm116_vm1, %v1076_v61, %v1077_v1  ;;  %v88_v61 = vld [vmem:[%s3179_s2 + $0x30] sm:$0xff] }
 0x2e0   :  { %2063 = vrot.lane.b32.xlu0 %v2062_v3, %s2129_s21  ;;  %2053 = vrot.lane.b32.xlu1 %v2052_v32, %s2130_s30 }
 0x2e4   :  { %2068 = vrot.lane.b32.xlu0 %v2067_v37, %s2129_s21  ;;  %1475 = vperm.xlu1 %1926, %v82_v17  }
 0x2e8   :  { %2073 = vrot.lane.b32.xlu0 %v2072_v54, %s2130_s30  ;;  %1485 = vperm.xlu1 %1926, %v84_v6  }
 0x2ec   :  { %2078 = vrot.lane.b32.xlu0 %v2077_v23, %s2130_s30  ;;  %1495 = vperm.xlu1 %1926, %v86_v9  }
 0x2f0   :  { %2083 = vrot.lane.b32.xlu0 %v2082_v55, %s2130_s30  ;;  %1505 = vperm.xlu1 %1926, %v88_v61  }
 0x2f4   :  { %1480 = vperm.xlu0 %1925, %v83_v27   ;;  %1515 = vperm.xlu1 %1926, %v90_v16  }
 0x2f8   :  { %1490 = vperm.xlu0 %1925, %v85_v0   ;;  %1525 = vperm.xlu1 %1926, %v92_v33  }
 0x2fc   :  { %1500 = vperm.xlu0 %1925, %v87_v36   ;;  %1535 = vperm.xlu1 %1926, %v94_v56  }
 0x300   :  { %1510 = vperm.xlu0 %1925, %v89_v57   ;;  %1545 = vperm.xlu1 %1926, %v96_v20  }
 0x304   :  { %1520 = vperm.xlu0 %1925, %v91_v42  }
 0x308   :  { %1530 = vperm.xlu0 %1925, %v93_v5  }
 0x30c   :  { %1540 = vperm.xlu0 %1925, %v95_v7  }
 0x310   :  { %1550 = vperm.xlu0 %1925, %v97_v50  }
 0x336   :  { %v2009_v35 = vpop.permute.xlu1 %2008 }
 0x337   :  { %v2011_v10 = vunpack.i.h.bf16 %v2009_v35  ;;  %v2010_v34 = vunpack.i.l.bf16 %v2009_v35 }
 0x339   :  { %v1259_v3 = vsel %vm294_vm2, %v2875_v49, %v2010_v34 }
 0x33a   :  { %v2014_v39 = vpop.permute.xlu1 %2013 }
 0x33b   :  { %v2016_v41 = vunpack.i.h.bf16 %v2014_v39  ;;  %v2015_v13 = vunpack.i.l.bf16 %v2014_v39 }
 0x33d   :  { %v1257_v52 = vsel %vm294_vm2, %v1096_v4, %v2015_v13  ;;  %v1258_v32 = vsel %vm294_vm2, %v2884_v28, %v2016_v41  ;;  %v1260_v28 = vsel %vm294_vm2, %v2859_v30, %v2011_v10 }
 0x33e   :  { %v2019_v60 = vpop.permute.xlu1 %2018 }
 0x33f   :  { %v2021_v2 = vunpack.i.h.bf16 %v2019_v60  ;;  %v2020_v38 = vunpack.i.l.bf16 %v2019_v60 }
 0x341   :  { %v1273_v47 = vsel %vm311_vm3, %v1257_v52, %v2020_v38  ;;  %v1274_v14 = vsel %vm311_vm3, %v1258_v32, %v2021_v2 }
 0x342   :  { %v1289_v21 = vpack.c.bf16 %v1274_v14, %v1273_v47  ;;  %v2024_v29 = vpop.permute.xlu1 %2023 }
 0x343   :  { %v2026_v51 = vunpack.i.h.bf16 %v2024_v29  ;;  %v2025_v31 = vunpack.i.l.bf16 %v2024_v29 }
 0x344   :  { %1811 = vmatprep.mubr.msk.bf16.mxu0 %vm391_vm4, %v1289_v21 }
 0x346   :  { %v2044_v46 = vpop.permute.xlu0 %2043  ;;  %v2029_v1 = vpop.permute.xlu1 %2028 }
 0x347   :  { %v2031_v37 = vunpack.i.h.bf16 %v2029_v1  ;;  %v2030_v63 = vunpack.i.l.bf16 %v2029_v1  ;;  %v2046_v41 = vunpack.i.h.bf16 %v2044_v46  ;;  %v2045_v13 = vunpack.i.l.bf16 %v2044_v46 }
 0x349   :  { %v1262_v30 = vsel %vm294_vm2, %v2949_v43, %v2031_v37  ;;  %v1261_v61 = vsel %vm294_vm2, %v2955_v24, %v2030_v63  ;;  %v1268_v38 = vsel %vm294_vm2, %v2983_v25, %v2046_v41 }
 0x34a   :  { %v2049_v18 = vpop.permute.xlu0 %2048  ;;  %v2034_v62 = vpop.permute.xlu1 %2033 }
 0x34b   :  { %v2036_v8 = vunpack.i.h.bf16 %v2034_v62  ;;  %v2035_v45 = vunpack.i.l.bf16 %v2034_v62  ;;  %v2051_v58 = vunpack.i.h.bf16 %v2049_v18  ;;  %v2050_v54 = vunpack.i.l.bf16 %v2049_v18 }
 0x34d   :  { %v1276_v15 = vsel %vm311_vm3, %v1260_v28, %v2036_v8  ;;  %v1275_v59 = vsel %vm311_vm3, %v1259_v3, %v2035_v45  ;;  %v1265_v27 = vsel %vm294_vm2, %v2999_v12, %v2050_v54  ;;  %v1266_v16 = vsel %vm294_vm2, %v2993_v48, %v2051_v58 }
 0x34e   :  { %v1290_v55 = vpack.c.bf16 %v1276_v15, %v1275_v59  ;;  %v2059_v4 = vpop.permute.xlu0 %2058  ;;  %v2039_v23 = vpop.permute.xlu1 %2038  ;;  %v1264_v12 = vsel %vm294_vm2, %v2932_v26, %v2026_v51  ;;  %v1263_v48 = vsel %vm294_vm2, %v2942_v40, %v2025_v31  ;;  %v1267_v40 = vsel %vm294_vm2, %v2989_v22, %v2045_v13 }
 0x34f   :  { %v2061_v17 = vunpack.i.h.bf16 %v2059_v4  ;;  %v2060_v49 = vunpack.i.l.bf16 %v2059_v4  ;;  %v2041_v6 = vunpack.i.h.bf16 %v2039_v23  ;;  %v2040_v9 = vunpack.i.l.bf16 %v2039_v23 }
 0x350   :  { %1812 = vmatmul.mubr.msk.bf16.vlgmr.msra.gmra.mrb[16].mxu0 %vm391_vm4, %v1290_v55 }
 0x351   :  { %v1281_v0 = vsel %vm311_vm3, %v1265_v27, %v2060_v49  ;;  %v1282_v33 = vsel %vm311_vm3, %v1266_v16, %v2061_v17  ;;  %v1277_v36 = vsel %vm311_vm3, %v1261_v61, %v2040_v9  ;;  %v1278_v56 = vsel %vm311_vm3, %v1262_v30, %v2041_v6 }
 0x352   :  { %v1293_v43 = vpack.c.bf16 %v1282_v33, %v1281_v0  ;;  %v1291_v57 = vpack.c.bf16 %v1278_v56, %v1277_v36  ;;  %v2064_v20 = vpop.permute.xlu0 %2063  ;;  %v2054_v24 = vpop.permute.xlu1 %2053 }
 0x353   :  { %v2056_v42 = vunpack.i.h.bf16 %v2054_v24  ;;  %v2055_v5 = vunpack.i.l.bf16 %v2054_v24  ;;  %v2066_v10 = vunpack.i.h.bf16 %v2064_v20  ;;  %v2065_v34 = vunpack.i.l.bf16 %v2064_v20 }
 0x354   :  { %1815 = vmatprep.mubr.msk.bf16.mxu0 %vm391_vm4, %v1291_v57  ;;  %1819 = vmatprep.mubr.msk.bf16.mxu1 %vm391_vm4, %v1293_v43 }
 0x355   :  { %v1279_v7 = vsel %vm311_vm3, %v1263_v48, %v2055_v5  ;;  %v1280_v50 = vsel %vm311_vm3, %v1264_v12, %v2056_v42  ;;  %v1272_v37 = vsel %vm294_vm2, %v3021_v19, %v2066_v10  ;;  %v1271_v63 = vsel %vm294_vm2, %v3025_v44, %v2065_v34  ;;  %v3147_v19 = vld [vmem:[%s3185_s8] ss:$0 sm:$0xff]  ;;  %s2132_s8 = smov [#allocation2]  }
 0x356   :  { %v1292_v35 = vpack.c.bf16 %v1280_v50, %v1279_v7  ;;  %v2069_v39 = vpop.permute.xlu0 %2068  ;;  %s1606_s14 = sshll.u32 %s2132_s8, 4  ;;  %s1607_s14 = int_to_ptr.vmem [resolvable:$true] %s1606_s14 }
 0x357   :  { %v2071_v52 = vunpack.i.h.bf16 %v2069_v39  ;;  %v2070_v32 = vunpack.i.l.bf16 %v2069_v39  ;;  %s2105_s15 = scalar_lea.vmem %s1607_s14, 2048  ;;  %p2110_p1 = scmp.lt.s32.totalorder %s1607_s14, %s1607_s14 }
 0x358   :  { %1816 = vmatmul.mubr.msk.bf16.gmra.mrb[20].mxu0 %vm391_vm4, %v1292_v35  ;;  %p2106_p0 = scmp.ne.s32.totalorder %s1607_s14, %s2105_s15  ;;  %p2111_p2 = scmp.lt.s32.totalorder %s2105_s15, %s2105_s15 }
 0x359   :  { %v1270_v18 = vsel %vm294_vm2, %v3029_v11, %v2071_v52  ;;  %v1269_v22 = vsel %vm294_vm2, %v3033_v53, %v2070_v32 }
 0x35a   :  { %v2074_v60 = vpop.permute.xlu0 %2073  ;;  %p2112_p3 = por %p2111_p2, %p2110_p1 }
 0x35b   :  { %v2076_v2 = vunpack.i.h.bf16 %v2074_v60  ;;  %v2075_v26 = vunpack.i.l.bf16 %v2074_v60 }
 0x35c   :  { %p2113_p4 = pnand %p2112_p3, %p2106_p0 }
 0x35d   :  { %v1284_v47 = vsel %vm311_vm3, %v1268_v38, %v2076_v2  ;;  %v1283_v14 = vsel %vm311_vm3, %v1267_v40, %v2075_v26 }
 0x35e   :  { %v1294_v21 = vpack.c.bf16 %v1284_v47, %v1283_v14  ;;  %v2079_v29 = vpop.permute.xlu0 %2078 }
 0x35f   :  { %v2081_v46 = vunpack.i.h.bf16 %v2079_v29  ;;  %v2080_v1 = vunpack.i.l.bf16 %v2079_v29 }
 0x360   :  { %1820 = vmatmul.mubr.msk.bf16.vlgmr.msra.gmra.mrb[16].mxu1 %vm391_vm4, %v1294_v21 }
 0x361   :  { %v1285_v25 = vsel %vm311_vm3, %v1269_v22, %v2080_v1  ;;  %v1286_v62 = vsel %vm311_vm3, %v1270_v18, %v2081_v46 }
 0x362   :  { %v1295_v3 = vpack.c.bf16 %v1286_v62, %v1285_v25  ;;  %v2084_v28 = vpop.permute.xlu0 %2083 }
 0x363   :  { %v2086_v8 = vunpack.i.h.bf16 %v2084_v28  ;;  %v2085_v45 = vunpack.i.l.bf16 %v2084_v28  ;;  %v1476_v54 = vpop.permute.xlu1 %1475 }
 0x364   :  { %1823 = vmatprep.mubr.msk.bf16.mxu1 %vm391_vm4, %v1295_v3 }
 0x365   :  { %v1288_v11 = vsel %vm311_vm3, %v1272_v37, %v2086_v8  ;;  %v1287_v53 = vsel %vm311_vm3, %v1271_v63, %v2085_v45 }
 0x366   :  { %v1296_v58 = vpack.c.bf16 %v1288_v11, %v1287_v53 }
 0x367   :  { %v1486_v59 = vpop.permute.xlu1 %1485 }
 0x368   :  { %1824 = vmatmul.mubr.msk.bf16.gmra.mrb[20].mxu1 %vm391_vm4, %v1296_v58 }
 0x36b   :  { %v1496_v31 = vpop.permute.xlu1 %1495 }
 0x36f   :  { %v1506_v17 = vpop.permute.xlu1 %1505 }
 0x373   :  { %v1481_v15 = vpop.permute.xlu0 %1480  ;;  %v1516_v20 = vpop.permute.xlu1 %1515 }
 0x377   :  { %v1491_v51 = vpop.permute.xlu0 %1490  ;;  %v1526_v40 = vpop.permute.xlu1 %1525 }
 0x37b   :  { %v1501_v55 = vpop.permute.xlu0 %1500  ;;  %v1536_v25 = vpop.permute.xlu1 %1535 }
 0x37f   :  { %v1511_v27 = vpop.permute.xlu0 %1510 }
 0x383   :  { %v1521_v48 = vpop.permute.xlu0 %1520 }
 0x387   :  { %v1531_v47 = vpop.permute.xlu0 %1530 }
 0x38b   :  { %v1541_v45 = vpop.permute.xlu0 %1540 }
 0x423   :  { %v1813_v44 = vpop.f32.mrb[16].mxu0 }
 0x424   :  { %v1419_v4 = vadd.f32 %v1813_v44, %v3147_v19  ;;  %v1410_v23 = vpop.f32.mrb[17].mxu0 }
 0x425   :  { %v1411_v49 = vadd.f32 %v3147_v19, %v1410_v23  ;;  %v1814_v6 = vpop.f32.mrb[18].mxu0  ;;  %v1551_v23 = vpop.permute.xlu0 %1550 }
 0x426   :  { %v1555_v9 = vmul.f32 %v1486_v59, %v1419_v4  ;;  %v1422_v30 = vadd.f32 %v1814_v6, %v3147_v19  ;;  %v1413_v61 = vpop.f32.mrb[19].mxu0  ;;  %v1546_v59 = vpop.permute.xlu1 %1545 }
 0x427   :  { %v1553_v16 = vmul.f32 %v1476_v54, %v1411_v49  ;;  %v1414_v0 = vadd.f32 %v3147_v19, %v1413_v61 }
 0x428   :  { %v1571_v33 = vmax.f32 %v1555_v9, 0.0  ;;  %v1556_v36 = vmul.f32 %v1491_v51, %v1422_v30 }
 0x429   :  { %v1569_v56 = vmax.f32 %v1553_v16, 0.0  ;;  %v1554_v43 = vmul.f32 %v1481_v15, %v1414_v0 }
 0x42a   :  { %1587 = vst [vmem:[#allocation2 + $0x10] sm:$0xff] %v1571_v33  ;;  %v1572_v57 = vmax.f32 %v1556_v36, 0.0 }
 0x42b   :  { %1585 = vst [vmem:[#allocation2] sm:$0xff] %v1569_v56  ;;  %v1570_v24 = vmax.f32 %v1554_v43, 0.0  ;;  %v1817_v42 = vpop.f32.mrb[20].mxu0 }
 0x42c   :  { %1588 = vst [vmem:[#allocation2 + $0x18] sm:$0xff] %v1572_v57  ;;  %v1435_v5 = vadd.f32 %v1817_v42, %v3147_v19  ;;  %v1426_v12 = vpop.f32.mrb[21].mxu0 }
 0x42d   :  { %1586 = vst [vmem:[#allocation2 + $0x8] sm:$0xff] %v1570_v24  ;;  %v1427_v7 = vadd.f32 %v3147_v19, %v1426_v12  ;;  %v1818_v50 = vpop.f32.mrb[22].mxu0 }
 0x42e   :  { %v1559_v35 = vmul.f32 %v1506_v17, %v1435_v5  ;;  %v1438_v39 = vadd.f32 %v1818_v50, %v3147_v19  ;;  %v1429_v41 = vpop.f32.mrb[23].mxu0 }
 0x42f   :  { %v1557_v13 = vmul.f32 %v1496_v31, %v1427_v7  ;;  %v1430_v60 = vadd.f32 %v3147_v19, %v1429_v41 }
 0x430   :  { %v1575_v2 = vmax.f32 %v1559_v35, 0.0  ;;  %v1560_v26 = vmul.f32 %v1511_v27, %v1438_v39 }
 0x431   :  { %v1573_v38 = vmax.f32 %v1557_v13, 0.0  ;;  %v1558_v52 = vmul.f32 %v1501_v55, %v1430_v60 }
 0x432   :  { %1591 = vst [vmem:[#allocation2 + $0x30] sm:$0xff] %v1575_v2  ;;  %v1576_v32 = vmax.f32 %v1560_v26, 0.0 }
 0x433   :  { %1589 = vst [vmem:[#allocation2 + $0x20] sm:$0xff] %v1573_v38  ;;  %v1574_v14 = vmax.f32 %v1558_v52, 0.0  ;;  %v1821_v21 = vpop.f32.mrb[16].mxu1 }
 0x434   :  { %1592 = vst [vmem:[#allocation2 + $0x38] sm:$0xff] %v1576_v32  ;;  %v1451_v29 = vadd.f32 %v1821_v21, %v3147_v19  ;;  %v1442_v46 = vpop.f32.mrb[17].mxu1 }
 0x435   :  { %1590 = vst [vmem:[#allocation2 + $0x28] sm:$0xff] %v1574_v14  ;;  %v1443_v1 = vadd.f32 %v3147_v19, %v1442_v46  ;;  %v1822_v10 = vpop.f32.mrb[18].mxu1 }
 0x436   :  { %v1563_v34 = vmul.f32 %v1526_v40, %v1451_v29  ;;  %v1454_v18 = vadd.f32 %v1822_v10, %v3147_v19  ;;  %v1445_v22 = vpop.f32.mrb[19].mxu1 }
 0x437   :  { %v1561_v62 = vmul.f32 %v1516_v20, %v1443_v1  ;;  %v1446_v3 = vadd.f32 %v3147_v19, %v1445_v22 }
 0x438   :  { %v1579_v28 = vmax.f32 %v1563_v34, 0.0  ;;  %v1564_v8 = vmul.f32 %v1531_v47, %v1454_v18 }
 0x439   :  { %v1577_v37 = vmax.f32 %v1561_v62, 0.0  ;;  %v1562_v63 = vmul.f32 %v1521_v48, %v1446_v3 }
 0x43a   :  { %1595 = vst [vmem:[#allocation2 + $0x50] sm:$0xff] %v1579_v28  ;;  %v1580_v11 = vmax.f32 %v1564_v8, 0.0 }
 0x43b   :  { %1593 = vst [vmem:[#allocation2 + $0x40] sm:$0xff] %v1577_v37  ;;  %v1578_v53 = vmax.f32 %v1562_v63, 0.0  ;;  %v1825_v58 = vpop.f32.mrb[20].mxu1 }
 0x43c   :  { %1596 = vst [vmem:[#allocation2 + $0x58] sm:$0xff] %v1580_v11  ;;  %v1467_v54 = vadd.f32 %v1825_v58, %v3147_v19  ;;  %v1458_v15 = vpop.f32.mrb[21].mxu1 }
 0x43d   :  { %1594 = vst [vmem:[#allocation2 + $0x48] sm:$0xff] %v1578_v53  ;;  %v1459_v51 = vadd.f32 %v3147_v19, %v1458_v15  ;;  %v1826_v31 = vpop.f32.mrb[22].mxu1 }
 0x43e   :  { %v1567_v55 = vmul.f32 %v1546_v59, %v1467_v54  ;;  %v1470_v44 = vadd.f32 %v1826_v31, %v3147_v19  ;;  %v1461_v4 = vpop.f32.mrb[23].mxu1 }
 0x43f   :  { %v1565_v17 = vmul.f32 %v1536_v25, %v1459_v51  ;;  %v1462_v49 = vadd.f32 %v3147_v19, %v1461_v4 }
 0x440   :  { %v1583_v6 = vmax.f32 %v1567_v55, 0.0  ;;  %v1568_v9 = vmul.f32 %v1551_v23, %v1470_v44 }
 0x441   :  { %v1581_v30 = vmax.f32 %v1565_v17, 0.0  ;;  %v1566_v61 = vmul.f32 %v1541_v45, %v1462_v49 }
 0x442   :  { %1599 = vst [vmem:[#allocation2 + $0x70] sm:$0xff] %v1583_v6  ;;  %v1584_v27 = vmax.f32 %v1568_v9, 0.0 }
 0x443   :  { %1597 = vst [vmem:[#allocation2 + $0x60] sm:$0xff] %v1581_v30  ;;  %v1582_v16 = vmax.f32 %v1566_v61, 0.0 }
 0x444   :  { %1600 = vst [vmem:[#allocation2 + $0x78] sm:$0xff] %v1584_v27 }
 0x445   :  { %1598 = vst [vmem:[#allocation2 + $0x68] sm:$0xff] %v1582_v16 }
 0x446   :  { %2116 = shalt.err (!%p2113_p4)
}
 0x447   :  { %s2117_s4 = scalar_lea.hbm %s3186_s9, 2048 }
 0x448   :  { %p2118_p5 = scmp.ne.s32.totalorder %s3186_s9, %s2117_s4  ;;  %p2121_p6 = scmp.lt.u32.totalorder %s2117_s4, %s3186_s9 }
 0x44a   :  { %p2123_p7 = pnand %p2121_p6, %p2118_p5 }
 0x44c   :  { %2126 = shalt.err (!%p2123_p7)
}
 0x44d   :  { %s2133_s18 = smov 128   ;;  %s2134_s19 = smov 8  }
 0x44e   :  { %1612 = dma.vmem_to_hbm [thread:$0]  %s1607_s14, 2048, %s3186_s9, [#allocation3], %s2133_s18, %s2133_s18, %s2134_s19  }
 0x44f   :  { %2127 = dma.done.wait [#allocation3], 2048  }
 0x450   :  { %2128 = vsyncadd [#allocation3], 4294965248 }
 0x451   :  { %1616 = vsyncpa [#allocation3], 1 }

</bundles_post_ra>
